<compile_context>
chip_gen: v5e
topology: v5e:2x2
jax: 0.10.0
libtpu: 0.0.40
codegen_flags: <defaults>
</compile_context>

<pallas_src>
import jax
import jax.numpy as jnp
from jax.experimental import pallas as pl
from jax.experimental.pallas import tpu as pltpu


# ----------------------------- Pallas kernel ---------------------------------
def make_kernel(n_head, head_dim, *, compute_dtype, eps=1e-5):
    H, hd = n_head, head_dim
    HD = H * hd

    def kernel(h_ref, mod_ref, wqkv_ref, bqkv_ref, wo_ref, bo_ref,
               w1_ref, b1_ref, w2_ref, b2_ref, out_ref):
        Bb, N, D = h_ref.shape
        G = Bb * H

        h = h_ref[...].astype(jnp.float32)                 # (Bb, N, D)
        mod = mod_ref[...]                                 # (Bb, 4, D) f32
        g1, b1m = mod[:, 0:1, :], mod[:, 1:2, :]           # SLN1 effective gamma/beta
        g2, b2m = mod[:, 2:3, :], mod[:, 3:4, :]           # SLN2 effective gamma/beta

        def mm(t):                                         # cast MXU operands only
            return t.astype(compute_dtype)

        def layernorm(t):                                  # over feature (lane) axis
            mu = jnp.mean(t, axis=-1, keepdims=True)
            var = jnp.mean(jnp.square(t - mu), axis=-1, keepdims=True)
            return (t - mu) * jax.lax.rsqrt(var + eps)

        # ---- SLN1 (LayerNorm affine already folded into g1 / b1m) ----
        a1 = g1 * layernorm(h) + b1m                       # (Bb, N, D)

        # ---- fused QKV projection: one MXU matmul over all Bb*N rows ----
        a1_2d = a1.reshape(Bb * N, D)
        qkv = jnp.dot(mm(a1_2d), wqkv_ref[...],
                      preferred_element_type=jnp.float32) + bqkv_ref[...]   # (Bb*N, 3HD)

        def to_heads(t2d):                                 # (Bb*N, HD) -> (Bb*H, N, hd)
            t = t2d.reshape(Bb, N, H, hd)
            return jnp.swapaxes(t, 1, 2).reshape(G, N, hd)

        qh = to_heads(qkv[:, 0:HD])
        kh = to_heads(qkv[:, HD:2 * HD])
        vh = to_heads(qkv[:, 2 * HD:3 * HD])

        # ---- batched-head L2 attention: softmax(-||q-k||^2 / sqrt(hd)) ----
        # (qn/kn/qk accumulated in f32; kn built directly as a row -> no transpose;
        #  the -scale factor is folded so scores are produced in one pass.)
        scale = 1.0 / (hd ** 0.5)
        qn = jnp.sum(qh * qh, axis=-1, keepdims=True)      # (G, N, 1)
        kn = jnp.sum(kh * kh, axis=-1)[:, None, :]         # (G, 1, N)
        qk = jnp.einsum('gqd,gkd->gqk', mm(qh), mm(kh),
                        preferred_element_type=jnp.float32)               # (G, N, N)
        scores = (2.0 * scale) * qk - scale * qn - scale * kn             # == -dist*scale
        scores = scores - jnp.max(scores, axis=-1, keepdims=True)
        e = jnp.exp(scores)
        attn = e * pl.reciprocal(jnp.sum(e, axis=-1, keepdims=True), approx=True)

        oh = jnp.einsum('gqk,gkd->gqd', mm(attn), mm(vh),
                        preferred_element_type=jnp.float32)               # (G, N, hd)
        o2d = jnp.swapaxes(oh.reshape(Bb, H, N, hd), 1, 2).reshape(Bb * N, HD)

        msa = jnp.dot(mm(o2d), wo_ref[...],
                      preferred_element_type=jnp.float32) + bo_ref[...]   # (Bb*N, D)

        # ---- residual, SLN2, MLP, residual ----
        htmp = msa.reshape(Bb, N, D) + h
        a2 = g2 * layernorm(htmp) + b2m
        hid = jnp.maximum(
            jnp.dot(mm(a2.reshape(Bb * N, D)), w1_ref[...],
                    preferred_element_type=jnp.float32) + b1_ref[...], 0.0)  # relu
        mlp = jnp.dot(mm(hid), w2_ref[...],
                      preferred_element_type=jnp.float32) + b2_ref[...]
        out_ref[...] = (mlp.reshape(Bb, N, D) + htmp).astype(out_ref.dtype)

    return kernel


# ------------------------------- wrapper --------------------------------------
def _pick_batch_block(B, N, D, *, target_rows=256, max_block_bytes=2 << 20):
    """Largest divisor of B giving >= target_rows matmul rows within a VMEM budget."""
    best = 1
    for bb in range(1, B + 1):
        if B % bb:
            continue
        if bb * N * D * 4 > max_block_bytes:
            break
        best = bb
        if bb * N >= target_rows:
            break
    return best


def transformer_sln_forward(h, x, params, *, n_head, head_dim, lp=2,
                            compute_dtype=None, batch_block=None, eps=1e-5):
    if lp != 2:
        # TODO(synk): lp==1 (L1 distance) needs a KV-tiled in-place reduction; only
        # the lp==2 path is implemented in this kernel.
        raise NotImplementedError("Pallas TransformerSLN kernel supports lp == 2 only.")

    B, N, D = h.shape
    f32 = jnp.float32
    compute_dtype = h.dtype if compute_dtype is None else compute_dtype
    Bb = _pick_batch_block(B, N, D) if batch_block is None else batch_block
    assert B % Bb == 0

    # --- precompute SLN modulation gamma(x)/beta(x) and fold LayerNorm affine ---
    def sln_mod(gw, gb, bw, bb_, lnw, lnb):
        gamma = (x.astype(f32) @ gw.astype(f32)) + gb          # (B, 1, D)
        beta = (x.astype(f32) @ bw.astype(f32)) + bb_          # (B, 1, D)
        return gamma * lnw, gamma * lnb + beta

    g1e, b1e = sln_mod(params["g1_w"], params["g1_b"], params["be1_w"],
                       params["be1_b"], params["ln1_w"], params["ln1_b"])
    g2e, b2e = sln_mod(params["g2_w"], params["g2_b"], params["be2_w"],
                       params["be2_b"], params["ln2_w"], params["ln2_b"])
    mod = jnp.concatenate([g1e, b1e, g2e, b2e], axis=1).astype(f32)      # (B, 4, D)

    # --- pack weights: fused QKV; MXU operand weights in compute_dtype ---
    wqkv = jnp.concatenate([params["wq"], params["wk"], params["wv"]],
                           axis=1).astype(compute_dtype)                 # (D, 3HD)
    bqkv = jnp.concatenate([params["bq"], params["bk"], params["bv"]],
                           axis=1).astype(f32)                           # (1, 3HD)
    wo = params["wo"].astype(compute_dtype)
    w1 = params["w1"].astype(compute_dtype)
    w2 = params["w2"].astype(compute_dtype)
    bo = params["bo"].astype(f32)
    b1 = params["b1"].astype(f32)
    b2 = params["b2"].astype(f32)

    def const_spec(arr):
        nd = arr.ndim
        return pl.BlockSpec(arr.shape, lambda g, _nd=nd: (0,) * _nd)

    in_specs = [
        pl.BlockSpec((Bb, N, D), lambda g: (g, 0, 0)),   # h (batch group)
        pl.BlockSpec((Bb, 4, D), lambda g: (g, 0, 0)),   # SLN modulation (batch group)
        const_spec(wqkv), const_spec(bqkv),
        const_spec(wo), const_spec(bo),
        const_spec(w1), const_spec(b1),
        const_spec(w2), const_spec(b2),
    ]
    out_spec = pl.BlockSpec((Bb, N, D), lambda g: (g, 0, 0))

    hf = pl.pallas_call(
        make_kernel(n_head, head_dim, compute_dtype=compute_dtype, eps=eps),
        out_shape=jax.ShapeDtypeStruct((B, N, D), h.dtype),
        grid=(B // Bb,),
        in_specs=in_specs,
        out_specs=out_spec,
        compiler_params=pltpu.CompilerParams(
            dimension_semantics=("parallel",)),
    )(h, mod, wqkv, bqkv, wo, bo, w1, b1, w2, b2)

    # module returns (x, hf); x is a pass-through
    return x, hf


# --------------------------- pure-JAX reference --------------------------------
def reference_forward(h, x, params, *, n_head, head_dim, lp=2, eps=1e-5):
    def sln(t, xl, lnw, lnb, gw, gb, bw, bb):
        mu = jnp.mean(t, axis=-1, keepdims=True)
        var = jnp.mean(jnp.square(t - mu), axis=-1, keepdims=True)
        tn = (t - mu) / jnp.sqrt(var + eps) * lnw + lnb
        gamma = xl @ gw + gb
        beta = xl @ bw + bb
        return gamma * tn + beta

    a1 = sln(h, x, params["ln1_w"], params["ln1_b"], params["g1_w"], params["g1_b"],
             params["be1_w"], params["be1_b"])
    q = a1 @ params["wq"] + params["bq"]
    k = a1 @ params["wk"] + params["bk"]
    v = a1 @ params["wv"] + params["bv"]
    B, N, HD = q.shape
    qh = q.reshape(B, N, n_head, head_dim).transpose(0, 2, 1, 3)
    kh = k.reshape(B, N, n_head, head_dim).transpose(0, 2, 1, 3)
    vh = v.reshape(B, N, n_head, head_dim).transpose(0, 2, 1, 3)
    if lp == 2:
        dist = jnp.sum(jnp.square(qh[:, :, :, None, :] - kh[:, :, None, :, :]), axis=-1)
    else:
        dist = jnp.sum(jnp.abs(qh[:, :, :, None, :] - kh[:, :, None, :, :]), axis=-1)
    attn = jax.nn.softmax(-dist / jnp.sqrt(head_dim * 1.0), axis=-1)
    o = jnp.einsum("bhqk,bhkd->bhqd", attn, vh).transpose(0, 2, 1, 3).reshape(B, N, HD)
    msa = o @ params["wo"] + params["bo"]
    htmp = msa + h
    a2 = sln(htmp, x, params["ln2_w"], params["ln2_b"], params["g2_w"], params["g2_b"],
             params["be2_w"], params["be2_b"])
    hid = jnp.maximum(a2 @ params["w1"] + params["b1"], 0.0)
    mlp = hid @ params["w2"] + params["b2"]
    return x, mlp + htmp


# --------------------------------- main ----------------------------------------
if __name__ == "__main__":
    B, N, D = 2, 8, 32            # batch, seq tokens, in_features
    n_head, head_dim = 4, D // 4  # attention_head_outdim = in_features // n_head
    HD = n_head * head_dim
    M = 2 * D                     # mlp hidden layer (mlp_layers=[2*in_features])
    lp = 2

    key = jax.random.PRNGKey(0)
    keys = jax.random.split(key, 24)

    def w(kk, shape, scale=0.05):
        return (scale * jax.random.normal(kk, shape)).astype(jnp.float32)

    params = {
        "ln1_w": jnp.ones((1, D), jnp.float32), "ln1_b": jnp.zeros((1, D), jnp.float32),
        "g1_w": w(keys[0], (D, D)), "g1_b": w(keys[1], (1, D)),
        "be1_w": w(keys[2], (D, D)), "be1_b": w(keys[3], (1, D)),
        "wq": w(keys[4], (D, HD)), "bq": w(keys[5], (1, HD)),
        "wk": w(keys[6], (D, HD)), "bk": w(keys[7], (1, HD)),
        "wv": w(keys[8], (D, HD)), "bv": w(keys[9], (1, HD)),
        "wo": w(keys[10], (HD, D)), "bo": w(keys[11], (1, D)),
        "ln2_w": jnp.ones((1, D), jnp.float32), "ln2_b": jnp.zeros((1, D), jnp.float32),
        "g2_w": w(keys[12], (D, D)), "g2_b": w(keys[13], (1, D)),
        "be2_w": w(keys[14], (D, D)), "be2_b": w(keys[15], (1, D)),
        "w1": w(keys[16], (D, M)), "b1": w(keys[17], (1, M)),
        "w2": w(keys[18], (M, D)), "b2": w(keys[19], (1, D)),
    }

    h = jax.random.normal(keys[20], (B, N, D), jnp.float32)
    x = jax.random.normal(keys[21], (B, 1, D), jnp.float32)

    # pure-JAX reference
    x_ref, hf_ref = reference_forward(h, x, params, n_head=n_head,
                                      head_dim=head_dim, lp=lp)

    # f32 kernel (matches module semantics tightly)
    x_out, hf = transformer_sln_forward(h, x, params, n_head=n_head,
                                        head_dim=head_dim, lp=lp)
    jax.block_until_ready(hf)
    assert jnp.allclose(hf, hf_ref, atol=2e-3, rtol=2e-3), "f32 kernel mismatch vs reference"
    assert jnp.allclose(x_out, x), "x pass-through mismatch"

    # bf16-MXU-operand variant (v6e/v7x fast path): f32 accumulation, loose tolerance
    _, hf_bf16 = transformer_sln_forward(h, x, params, n_head=n_head,
                                         head_dim=head_dim, lp=lp,
                                         compute_dtype=jnp.bfloat16)
    jax.block_until_ready(hf_bf16)
    assert jnp.allclose(hf_bf16, hf_ref, atol=5e-2, rtol=5e-2), "bf16 kernel mismatch"

    print("KERNEL_OK")
</pallas_src>

<mosaic_0001>
module attributes {stable_mosaic.version = 11 : i64} {
  func.func @kernel(%arg0: i32, %arg1: memref<2x8x32xf32, #tpu.memory_space<vmem>>, %arg2: memref<2x4x32xf32, #tpu.memory_space<vmem>>, %arg3: memref<32x96xf32, #tpu.memory_space<vmem>>, %arg4: memref<1x96xf32, #tpu.memory_space<vmem>>, %arg5: memref<32x32xf32, #tpu.memory_space<vmem>>, %arg6: memref<1x32xf32, #tpu.memory_space<vmem>>, %arg7: memref<32x64xf32, #tpu.memory_space<vmem>>, %arg8: memref<1x64xf32, #tpu.memory_space<vmem>>, %arg9: memref<64x32xf32, #tpu.memory_space<vmem>>, %arg10: memref<1x32xf32, #tpu.memory_space<vmem>>, %arg11: memref<2x8x32xf32, #tpu.memory_space<vmem>>) attributes {dimension_semantics = [#tpu.dimension_semantics<parallel>], iteration_bounds = array<i64: 1>, scalar_prefetch = 0 : i64, scratch_operands = 0 : i64, tpu.core_type = #tpu.core_type<tc>, window_params = [{transform_indices = @transform_0, window_bounds = array<i64: 2, 8, 32>}, {transform_indices = @transform_1, window_bounds = array<i64: 2, 4, 32>}, {pipeline_mode = #tpu.pipeline_mode<synchronous>, transform_indices = @transform_2, window_bounds = array<i64: 32, 96>}, {pipeline_mode = #tpu.pipeline_mode<synchronous>, transform_indices = @transform_3, window_bounds = array<i64: 1, 96>}, {pipeline_mode = #tpu.pipeline_mode<synchronous>, transform_indices = @transform_4, window_bounds = array<i64: 32, 32>}, {pipeline_mode = #tpu.pipeline_mode<synchronous>, transform_indices = @transform_5, window_bounds = array<i64: 1, 32>}, {pipeline_mode = #tpu.pipeline_mode<synchronous>, transform_indices = @transform_6, window_bounds = array<i64: 32, 64>}, {pipeline_mode = #tpu.pipeline_mode<synchronous>, transform_indices = @transform_7, window_bounds = array<i64: 1, 64>}, {pipeline_mode = #tpu.pipeline_mode<synchronous>, transform_indices = @transform_8, window_bounds = array<i64: 64, 32>}, {pipeline_mode = #tpu.pipeline_mode<synchronous>, transform_indices = @transform_9, window_bounds = array<i64: 1, 32>}, {transform_indices = @transform_10, window_bounds = array<i64: 2, 8, 32>}]} {
    %c0 = arith.constant 0 : index
    %c0_0 = arith.constant 0 : index
    %c0_1 = arith.constant 0 : index
    %0 = vector.load %arg1[%c0, %c0_0, %c0_1] : memref<2x8x32xf32, #tpu.memory_space<vmem>>, vector<2x8x32xf32>
    %c0_2 = arith.constant 0 : index
    %c0_3 = arith.constant 0 : index
    %c0_4 = arith.constant 0 : index
    %1 = vector.load %arg2[%c0_2, %c0_3, %c0_4] : memref<2x4x32xf32, #tpu.memory_space<vmem>>, vector<2x4x32xf32>
    %2 = vector.extract_strided_slice %1 {offsets = [0, 0, 0], sizes = [2, 1, 32], strides = [1, 1, 1]} : vector<2x4x32xf32> to vector<2x1x32xf32>
    %3 = vector.extract_strided_slice %1 {offsets = [0, 1, 0], sizes = [2, 1, 32], strides = [1, 1, 1]} : vector<2x4x32xf32> to vector<2x1x32xf32>
    %4 = vector.extract_strided_slice %1 {offsets = [0, 2, 0], sizes = [2, 1, 32], strides = [1, 1, 1]} : vector<2x4x32xf32> to vector<2x1x32xf32>
    %5 = vector.extract_strided_slice %1 {offsets = [0, 3, 0], sizes = [2, 1, 32], strides = [1, 1, 1]} : vector<2x4x32xf32> to vector<2x1x32xf32>
    %cst = arith.constant dense<0.000000e+00> : vector<2x8xf32>
    %6 = vector.multi_reduction <add>, %0, %cst [2] : vector<2x8x32xf32> to vector<2x8xf32>
    %7 = vector.shape_cast %6 : vector<2x8xf32> to vector<2x8x1xf32>
    %cst_5 = arith.constant 3.200000e+01 : f32
    %8 = vector.broadcast %cst_5 : f32 to vector<2x8x1xf32>
    %9 = arith.divf %7, %8 : vector<2x8x1xf32>
    %10 = vector.broadcast %9 : vector<2x8x1xf32> to vector<2x8x32xf32>
    %11 = arith.subf %0, %10 : vector<2x8x32xf32>
    %12 = arith.mulf %11, %11 : vector<2x8x32xf32>
    %cst_6 = arith.constant dense<0.000000e+00> : vector<2x8xf32>
    %13 = vector.multi_reduction <add>, %12, %cst_6 [2] : vector<2x8x32xf32> to vector<2x8xf32>
    %14 = vector.shape_cast %13 : vector<2x8xf32> to vector<2x8x1xf32>
    %cst_7 = arith.constant 3.200000e+01 : f32
    %15 = vector.broadcast %cst_7 : f32 to vector<2x8x1xf32>
    %16 = arith.divf %14, %15 : vector<2x8x1xf32>
    %17 = vector.broadcast %9 : vector<2x8x1xf32> to vector<2x8x32xf32>
    %18 = arith.subf %0, %17 : vector<2x8x32xf32>
    %cst_8 = arith.constant 9.99999974E-6 : f32
    %19 = vector.broadcast %cst_8 : f32 to vector<2x8x1xf32>
    %20 = arith.addf %16, %19 : vector<2x8x1xf32>
    %21 = math.rsqrt %20 : vector<2x8x1xf32>
    %22 = vector.broadcast %21 : vector<2x8x1xf32> to vector<2x8x32xf32>
    %23 = arith.mulf %18, %22 : vector<2x8x32xf32>
    %24 = vector.broadcast %2 : vector<2x1x32xf32> to vector<2x8x32xf32>
    %25 = arith.mulf %24, %23 : vector<2x8x32xf32>
    %26 = vector.broadcast %3 : vector<2x1x32xf32> to vector<2x8x32xf32>
    %27 = arith.addf %25, %26 : vector<2x8x32xf32>
    %28 = vector.shape_cast %27 : vector<2x8x32xf32> to vector<16x32xf32>
    %c0_9 = arith.constant 0 : index
    %c0_10 = arith.constant 0 : index
    %29 = vector.load %arg3[%c0_9, %c0_10] : memref<32x96xf32, #tpu.memory_space<vmem>>, vector<32x96xf32>
    %cst_11 = arith.constant dense<0.000000e+00> : vector<16x96xf32>
    %30 = tpu.matmul %28, %29, %cst_11 {dimension_numbers = #tpu.dot_dimension_numbers<[1], [0], [0], [1], [0, 0, 1, 1], [], []>} : vector<16x32xf32>, vector<32x96xf32>, vector<16x96xf32> -> vector<16x96xf32>
    %c0_12 = arith.constant 0 : index
    %c0_13 = arith.constant 0 : index
    %31 = vector.load %arg4[%c0_12, %c0_13] : memref<1x96xf32, #tpu.memory_space<vmem>>, vector<1x96xf32>
    %32 = vector.broadcast %31 : vector<1x96xf32> to vector<16x96xf32>
    %33 = arith.addf %30, %32 : vector<16x96xf32>
    %34 = vector.extract_strided_slice %33 {offsets = [0, 0], sizes = [16, 32], strides = [1, 1]} : vector<16x96xf32> to vector<16x32xf32>
    %35 = vector.shape_cast %34 : vector<16x32xf32> to vector<2x8x4x8xf32>
    %36 = tpu.transpose %35, [0, 2, 1, 3] : vector<2x8x4x8xf32> -> vector<2x4x8x8xf32>
    %37 = vector.shape_cast %36 : vector<2x4x8x8xf32> to vector<8x8x8xf32>
    %38 = vector.extract_strided_slice %33 {offsets = [0, 32], sizes = [16, 32], strides = [1, 1]} : vector<16x96xf32> to vector<16x32xf32>
    %39 = vector.shape_cast %38 : vector<16x32xf32> to vector<2x8x4x8xf32>
    %40 = tpu.transpose %39, [0, 2, 1, 3] : vector<2x8x4x8xf32> -> vector<2x4x8x8xf32>
    %41 = vector.shape_cast %40 : vector<2x4x8x8xf32> to vector<8x8x8xf32>
    %42 = vector.extract_strided_slice %33 {offsets = [0, 64], sizes = [16, 32], strides = [1, 1]} : vector<16x96xf32> to vector<16x32xf32>
    %43 = vector.shape_cast %42 : vector<16x32xf32> to vector<2x8x4x8xf32>
    %44 = tpu.transpose %43, [0, 2, 1, 3] : vector<2x8x4x8xf32> -> vector<2x4x8x8xf32>
    %45 = vector.shape_cast %44 : vector<2x4x8x8xf32> to vector<8x8x8xf32>
    %46 = arith.mulf %37, %37 : vector<8x8x8xf32>
    %cst_14 = arith.constant dense<0.000000e+00> : vector<8x8xf32>
    %47 = vector.multi_reduction <add>, %46, %cst_14 [2] : vector<8x8x8xf32> to vector<8x8xf32>
    %48 = vector.shape_cast %47 : vector<8x8xf32> to vector<8x8x1xf32>
    %49 = arith.mulf %41, %41 : vector<8x8x8xf32>
    %cst_15 = arith.constant dense<0.000000e+00> : vector<8x8xf32>
    %50 = vector.multi_reduction <add>, %49, %cst_15 [2] : vector<8x8x8xf32> to vector<8x8xf32>
    %51 = vector.shape_cast %50 : vector<8x8xf32> to vector<8x1x8xf32>
    "tpu.trace_start"() <{level = 10 : i32, message = "gqd,gkd->gqk"}> : () -> ()
    %cst_16 = arith.constant dense<0.000000e+00> : vector<8x8x8xf32>
    %52 = tpu.matmul %37, %41, %cst_16 {dimension_numbers = #tpu.dot_dimension_numbers<[2], [2], [1], [1], [0, 0, 0, 1, 1, 1], [0], [0]>} : vector<8x8x8xf32>, vector<8x8x8xf32>, vector<8x8x8xf32> -> vector<8x8x8xf32>
    "tpu.trace_stop"() : () -> ()
    %cst_17 = arith.constant 0.707106769 : f32
    %53 = vector.broadcast %cst_17 : f32 to vector<8x8x8xf32>
    %54 = arith.mulf %53, %52 : vector<8x8x8xf32>
    %cst_18 = arith.constant 0.353553385 : f32
    %55 = vector.broadcast %cst_18 : f32 to vector<8x8x1xf32>
    %56 = arith.mulf %55, %48 : vector<8x8x1xf32>
    %57 = vector.broadcast %56 : vector<8x8x1xf32> to vector<8x8x8xf32>
    %58 = arith.subf %54, %57 : vector<8x8x8xf32>
    %cst_19 = arith.constant 0.353553385 : f32
    %59 = vector.broadcast %cst_19 : f32 to vector<8x1x8xf32>
    %60 = arith.mulf %59, %51 : vector<8x1x8xf32>
    %61 = vector.broadcast %60 : vector<8x1x8xf32> to vector<8x8x8xf32>
    %62 = arith.subf %58, %61 : vector<8x8x8xf32>
    %cst_20 = arith.constant dense<0xFF800000> : vector<8x8xf32>
    %63 = vector.multi_reduction <maximumf>, %62, %cst_20 [2] : vector<8x8x8xf32> to vector<8x8xf32>
    %64 = vector.shape_cast %63 : vector<8x8xf32> to vector<8x8x1xf32>
    %65 = vector.broadcast %64 : vector<8x8x1xf32> to vector<8x8x8xf32>
    %66 = arith.subf %62, %65 : vector<8x8x8xf32>
    %67 = math.exp %66 : vector<8x8x8xf32>
    %cst_21 = arith.constant dense<0.000000e+00> : vector<8x8xf32>
    %68 = vector.multi_reduction <add>, %67, %cst_21 [2] : vector<8x8x8xf32> to vector<8x8xf32>
    %69 = vector.shape_cast %68 : vector<8x8xf32> to vector<8x8x1xf32>
    %70 = tpu.reciprocal %69 {approx = true} : vector<8x8x1xf32> -> vector<8x8x1xf32>
    %71 = vector.broadcast %70 : vector<8x8x1xf32> to vector<8x8x8xf32>
    %72 = arith.mulf %67, %71 : vector<8x8x8xf32>
    "tpu.trace_start"() <{level = 10 : i32, message = "gqk,gkd->gqd"}> : () -> ()
    %cst_22 = arith.constant dense<0.000000e+00> : vector<8x8x8xf32>
    %73 = tpu.matmul %72, %45, %cst_22 {dimension_numbers = #tpu.dot_dimension_numbers<[2], [1], [1], [2], [0, 0, 0, 1, 1, 2], [0], [0]>} : vector<8x8x8xf32>, vector<8x8x8xf32>, vector<8x8x8xf32> -> vector<8x8x8xf32>
    "tpu.trace_stop"() : () -> ()
    %74 = vector.shape_cast %73 : vector<8x8x8xf32> to vector<2x4x8x8xf32>
    %75 = tpu.transpose %74, [0, 2, 1, 3] : vector<2x4x8x8xf32> -> vector<2x8x4x8xf32>
    %76 = vector.shape_cast %75 : vector<2x8x4x8xf32> to vector<16x32xf32>
    %c0_23 = arith.constant 0 : index
    %c0_24 = arith.constant 0 : index
    %77 = vector.load %arg5[%c0_23, %c0_24] : memref<32x32xf32, #tpu.memory_space<vmem>>, vector<32x32xf32>
    %cst_25 = arith.constant dense<0.000000e+00> : vector<16x32xf32>
    %78 = tpu.matmul %76, %77, %cst_25 {dimension_numbers = #tpu.dot_dimension_numbers<[1], [0], [0], [1], [0, 0, 1, 1], [], []>} : vector<16x32xf32>, vector<32x32xf32>, vector<16x32xf32> -> vector<16x32xf32>
    %c0_26 = arith.constant 0 : index
    %c0_27 = arith.constant 0 : index
    %79 = vector.load %arg6[%c0_26, %c0_27] : memref<1x32xf32, #tpu.memory_space<vmem>>, vector<1x32xf32>
    %80 = vector.broadcast %79 : vector<1x32xf32> to vector<16x32xf32>
    %81 = arith.addf %78, %80 : vector<16x32xf32>
    %82 = vector.shape_cast %81 : vector<16x32xf32> to vector<2x8x32xf32>
    %83 = arith.addf %82, %0 : vector<2x8x32xf32>
    %cst_28 = arith.constant dense<0.000000e+00> : vector<2x8xf32>
    %84 = vector.multi_reduction <add>, %83, %cst_28 [2] : vector<2x8x32xf32> to vector<2x8xf32>
    %85 = vector.shape_cast %84 : vector<2x8xf32> to vector<2x8x1xf32>
    %cst_29 = arith.constant 3.200000e+01 : f32
    %86 = vector.broadcast %cst_29 : f32 to vector<2x8x1xf32>
    %87 = arith.divf %85, %86 : vector<2x8x1xf32>
    %88 = vector.broadcast %87 : vector<2x8x1xf32> to vector<2x8x32xf32>
    %89 = arith.subf %83, %88 : vector<2x8x32xf32>
    %90 = arith.mulf %89, %89 : vector<2x8x32xf32>
    %cst_30 = arith.constant dense<0.000000e+00> : vector<2x8xf32>
    %91 = vector.multi_reduction <add>, %90, %cst_30 [2] : vector<2x8x32xf32> to vector<2x8xf32>
    %92 = vector.shape_cast %91 : vector<2x8xf32> to vector<2x8x1xf32>
    %cst_31 = arith.constant 3.200000e+01 : f32
    %93 = vector.broadcast %cst_31 : f32 to vector<2x8x1xf32>
    %94 = arith.divf %92, %93 : vector<2x8x1xf32>
    %95 = vector.broadcast %87 : vector<2x8x1xf32> to vector<2x8x32xf32>
    %96 = arith.subf %83, %95 : vector<2x8x32xf32>
    %cst_32 = arith.constant 9.99999974E-6 : f32
    %97 = vector.broadcast %cst_32 : f32 to vector<2x8x1xf32>
    %98 = arith.addf %94, %97 : vector<2x8x1xf32>
    %99 = math.rsqrt %98 : vector<2x8x1xf32>
    %100 = vector.broadcast %99 : vector<2x8x1xf32> to vector<2x8x32xf32>
    %101 = arith.mulf %96, %100 : vector<2x8x32xf32>
    %102 = vector.broadcast %4 : vector<2x1x32xf32> to vector<2x8x32xf32>
    %103 = arith.mulf %102, %101 : vector<2x8x32xf32>
    %104 = vector.broadcast %5 : vector<2x1x32xf32> to vector<2x8x32xf32>
    %105 = arith.addf %103, %104 : vector<2x8x32xf32>
    %106 = vector.shape_cast %105 : vector<2x8x32xf32> to vector<16x32xf32>
    %c0_33 = arith.constant 0 : index
    %c0_34 = arith.constant 0 : index
    %107 = vector.load %arg7[%c0_33, %c0_34] : memref<32x64xf32, #tpu.memory_space<vmem>>, vector<32x64xf32>
    %cst_35 = arith.constant dense<0.000000e+00> : vector<16x64xf32>
    %108 = tpu.matmul %106, %107, %cst_35 {dimension_numbers = #tpu.dot_dimension_numbers<[1], [0], [0], [1], [0, 0, 1, 1], [], []>} : vector<16x32xf32>, vector<32x64xf32>, vector<16x64xf32> -> vector<16x64xf32>
    %c0_36 = arith.constant 0 : index
    %c0_37 = arith.constant 0 : index
    %109 = vector.load %arg8[%c0_36, %c0_37] : memref<1x64xf32, #tpu.memory_space<vmem>>, vector<1x64xf32>
    %110 = vector.broadcast %109 : vector<1x64xf32> to vector<16x64xf32>
    %111 = arith.addf %108, %110 : vector<16x64xf32>
    %cst_38 = arith.constant 0.000000e+00 : f32
    %112 = vector.broadcast %cst_38 : f32 to vector<16x64xf32>
    %113 = arith.maximumf %111, %112 : vector<16x64xf32>
    %c0_39 = arith.constant 0 : index
    %c0_40 = arith.constant 0 : index
    %114 = vector.load %arg9[%c0_39, %c0_40] : memref<64x32xf32, #tpu.memory_space<vmem>>, vector<64x32xf32>
    %cst_41 = arith.constant dense<0.000000e+00> : vector<16x32xf32>
    %115 = tpu.matmul %113, %114, %cst_41 {dimension_numbers = #tpu.dot_dimension_numbers<[1], [0], [0], [1], [0, 0, 1, 1], [], []>} : vector<16x64xf32>, vector<64x32xf32>, vector<16x32xf32> -> vector<16x32xf32>
    %c0_42 = arith.constant 0 : index
    %c0_43 = arith.constant 0 : index
    %116 = vector.load %arg10[%c0_42, %c0_43] : memref<1x32xf32, #tpu.memory_space<vmem>>, vector<1x32xf32>
    %117 = vector.broadcast %116 : vector<1x32xf32> to vector<16x32xf32>
    %118 = arith.addf %115, %117 : vector<16x32xf32>
    %119 = vector.shape_cast %118 : vector<16x32xf32> to vector<2x8x32xf32>
    %120 = arith.addf %119, %83 : vector<2x8x32xf32>
    %c0_44 = arith.constant 0 : index
    %c0_45 = arith.constant 0 : index
    %c0_46 = arith.constant 0 : index
    %121 = vector.load %arg11[%c0_44, %c0_45, %c0_46] : memref<2x8x32xf32, #tpu.memory_space<vmem>>, vector<2x8x32xf32>
    tpu.vector_store %arg11[%c0_44, %c0_45, %c0_46], %120 {strides = array<i32>} : memref<2x8x32xf32, #tpu.memory_space<vmem>>, vector<2x8x32xf32>,
    return
  }
  func.func @transform_0(%arg0: i32) -> (i32, i32, i32) {
    %c0_i32 = arith.constant 0 : i32
    %c0_i32_0 = arith.constant 0 : i32
    %c0_i32_1 = arith.constant 0 : i32
    return %arg0, %c0_i32, %c0_i32_0 : i32, i32, i32
  }
  func.func @transform_1(%arg0: i32) -> (i32, i32, i32) {
    %c0_i32 = arith.constant 0 : i32
    %c0_i32_0 = arith.constant 0 : i32
    %c0_i32_1 = arith.constant 0 : i32
    return %arg0, %c0_i32, %c0_i32_0 : i32, i32, i32
  }
  func.func @transform_2(%arg0: i32) -> (i32, i32) {
    %c0_i32 = arith.constant 0 : i32
    %c0_i32_0 = arith.constant 0 : i32
    %c0_i32_1 = arith.constant 0 : i32
    return %c0_i32, %c0_i32_0 : i32, i32
  }
  func.func @transform_3(%arg0: i32) -> (i32, i32) {
    %c0_i32 = arith.constant 0 : i32
    %c0_i32_0 = arith.constant 0 : i32
    %c0_i32_1 = arith.constant 0 : i32
    return %c0_i32, %c0_i32_0 : i32, i32
  }
  func.func @transform_4(%arg0: i32) -> (i32, i32) {
    %c0_i32 = arith.constant 0 : i32
    %c0_i32_0 = arith.constant 0 : i32
    %c0_i32_1 = arith.constant 0 : i32
    return %c0_i32, %c0_i32_0 : i32, i32
  }
  func.func @transform_5(%arg0: i32) -> (i32, i32) {
    %c0_i32 = arith.constant 0 : i32
    %c0_i32_0 = arith.constant 0 : i32
    %c0_i32_1 = arith.constant 0 : i32
    return %c0_i32, %c0_i32_0 : i32, i32
  }
  func.func @transform_6(%arg0: i32) -> (i32, i32) {
    %c0_i32 = arith.constant 0 : i32
    %c0_i32_0 = arith.constant 0 : i32
    %c0_i32_1 = arith.constant 0 : i32
    return %c0_i32, %c0_i32_0 : i32, i32
  }
  func.func @transform_7(%arg0: i32) -> (i32, i32) {
    %c0_i32 = arith.constant 0 : i32
    %c0_i32_0 = arith.constant 0 : i32
    %c0_i32_1 = arith.constant 0 : i32
    return %c0_i32, %c0_i32_0 : i32, i32
  }
  func.func @transform_8(%arg0: i32) -> (i32, i32) {
    %c0_i32 = arith.constant 0 : i32
    %c0_i32_0 = arith.constant 0 : i32
    %c0_i32_1 = arith.constant 0 : i32
    return %c0_i32, %c0_i32_0 : i32, i32
  }
  func.func @transform_9(%arg0: i32) -> (i32, i32) {
    %c0_i32 = arith.constant 0 : i32
    %c0_i32_0 = arith.constant 0 : i32
    %c0_i32_1 = arith.constant 0 : i32
    return %c0_i32, %c0_i32_0 : i32, i32
  }
  func.func @transform_10(%arg0: i32) -> (i32, i32, i32) {
    %c0_i32 = arith.constant 0 : i32
    %c0_i32_0 = arith.constant 0 : i32
    %c0_i32_1 = arith.constant 0 : i32
    return %arg0, %c0_i32, %c0_i32_0 : i32, i32, i32
  }
}

</mosaic_0001>

<bundles_post_ra>
// kernel: tpu_custom_call.1
= control target key start
LH: loop header
LB: loop body
LE: loop exit
PB: predicated region body
PF: predicated region fallthrough
CT: control target
= control target key end

     0   :  { %15 = vsyncpa [#allocation3], 0  ;;  %s2967_s0 = inlined_call_operand.hbm [shape: f32[2,8,32], index: 0, kind: input, shape index: {}]   ;;  %s2968_s1 = inlined_call_operand.hbm [shape: f32[2,4,32], index: 1, kind: input, shape index: {}]   ;;  %s2969_s2 = inlined_call_operand.vmem [shape: f32[32,96], index: 2, kind: input, shape index: {}]   ;;  %s2970_s3 = inlined_call_operand.vmem [shape: f32[1,96], index: 3, kind: input, shape index: {}]   ;;  %s2971_s4 = inlined_call_operand.vmem [shape: f32[32,32], index: 4, kind: input, shape index: {}]   ;;  %s2972_s5 = inlined_call_operand.vmem [shape: f32[1,32], index: 5, kind: input, shape index: {}]   ;;  %s2973_s6 = inlined_call_operand.vmem [shape: f32[32,64], index: 6, kind: input, shape index: {}]   ;;  %s2974_s7 = inlined_call_operand.vmem [shape: f32[1,64], index: 7, kind: input, shape index: {}]   ;;  %s2975_s8 = inlined_call_operand.vmem [shape: f32[64,32], index: 8, kind: input, shape index: {}]   ;;  %s2976_s9 = inlined_call_operand.vmem [shape: f32[1,32], index: 9, kind: input, shape index: {}]   ;;  %s2977_s10 = inlined_call_operand.hbm [shape: f32[2,8,32], index: 10, kind: output, shape index: {}]  }
   0x1   :  { %16 = vsyncpa [#allocation6], 0 }
   0x2   :  { %17 = vsyncpa [#allocation4], 0  ;;  %s22_s15 = sshll.u32 %s2967_s0, 4  ;;  %s2207_s16 = smov [#allocation2]   ;;  %s23_s15 = int_to_ptr.hbm [resolvable:$true] %s22_s15 }
   0x3   :  { %s24_s17 = sshll.u32 %s2207_s16, 4  ;;  %s35_s20 = sshll.u32 %s2968_s1, 4  ;;  %s25_s17 = int_to_ptr.vmem [resolvable:$true] %s24_s17  ;;  %s36_s20 = int_to_ptr.hbm [resolvable:$true] %s35_s20 }
   0x4   :  { %s2208_s21 = smov 128   ;;  %s2209_s22 = smov 8  }
   0x5   :  { %30 = dma.hbm_to_vmem [thread:$0]  %s23_s15, 256, %s25_s17, [#allocation3], %s2208_s21, %s2208_s21, %s2209_s22  }
   0x6   :  { %s2210_s23 = smov [#allocation5]   ;;  %s2211_s25 = smov 64  }
   0x7   :  { %s37_s24 = sshll.u32 %s2210_s23, 4  ;;  %s2212_s0 = smov 4   ;;  %s38_s24 = int_to_ptr.vmem [resolvable:$true] %s37_s24 }
   0x8   :  { %43 = dma.hbm_to_vmem [thread:$0]  %s36_s20, 128, %s38_s24, [#allocation6], %s2211_s25, %s2211_s25, %s2212_s0  }
   0x9   :  { %2201 = dma.done.wait [#allocation3], 256  }
   0xa   :  { %2202 = vsyncadd [#allocation3], 4294967040 }
   0xb   :  { %2203 = dma.done.wait [#allocation6], 128  }
   0xc   :  { %2204 = vsyncadd [#allocation6], 4294967168  ;;  %vm72_vm0 = vcmask 261120   ;;  %v68_v0 = vld [vmem:[#allocation2] sm:$0xff]  ;;  %v69_v2 = vld [vmem:[#allocation2 + $0x8] sm:$0xff]  ;;  %v2213_v4 = vmov 32.0  }
   0xd   :  { %v73_v1 = vsel %vm72_vm0, %v68_v0, 0.0  ;;  %v76_v3 = vsel %vm72_vm0, %v69_v2, 0.0  ;;  %2083 = vrcp.f32 %v2213_v4  ;;  %v135_v21 = vld [vmem:[%s2969_s2 + $0x18] sm:$0xff]  ;;  %v134_v22 = vld [vmem:[%s2969_s2 + $0x10] sm:$0xff]  ;;  %v133_v23 = vld [vmem:[%s2969_s2 + $0x8] sm:$0xff]  ;;  %s2214_s14 = smov 104  }
   0xe   :  { %74 = vadd.xlane.f32.xlu0 %v73_v1  ;;  %158 = vmatpush.msra.mxu0 %v135_v21  ;;  %v132_v24 = vld [vmem:[%s2969_s2] sm:$0xff]  ;;  %v70_v36 = vld [vmem:[#allocation5] sm:$0xf]  ;;  %v71_v48 = vld [vmem:[#allocation5 + $0x4] sm:$0xf]  ;;  %s2215_s15 = smov 120  }
   0xf   :  { %v124_v40 = vperm.slane %v70_v36, 0  ;;  %v128_v44 = vperm.slane %v70_v36, 1  ;;  %v125_v51 = vperm.slane %v71_v48, 0  ;;  %v129_v54 = vperm.slane %v71_v48, 1  ;;  %v2079_v57 = vld [vmem:[%s2970_s3] ss:$0 sm:$0xff] }
  0x10   :  { %159 = vmatpush.msra.mxu0 %v134_v22  ;;  %s2216_s16 = smov 112   ;;  %s2217_s3 = smov 96   ;;  %vm190_vm8 = vcmask 1047556   ;;  %vm906_vm9 = vcmask 64512   ;;  %vm1809_vm10 = vcmask 130048   ;;  %vm1812_vm11 = vcmask 195584  }
  0x11   :  { %s2220_s17 = smov 24   ;;  %s2221_s18 = smov 16  }
  0x12   :  { %160 = vmatpush.msra.mxu0 %v133_v23  ;;  %s1997_s12 = sshll.u32 %s2977_s10, 4  ;;  %s1998_s12 = int_to_ptr.hbm [resolvable:$true] %s1997_s12 }
  0x13   :  { %v2084_v5 = vpop.eup %2083 }
  0x14   :  { %v80_v6 = vmul.f32 32.0, %v2084_v5  ;;  %vm84_vm1 = vweird.f32 %v2084_v5  ;;  %161 = vmatpush.msra.mxu0 %v132_v24 }
  0x16   :  { %77 = vadd.xlane.f32.xlu0 %v76_v3  ;;  %v81_v7 = vsub.f32 1.0, %v80_v6 }
  0x18   :  { %v82_v8 = vmul.f32 %v2084_v5, %v81_v7 }
  0x1a   :  { %v83_v9 = vadd.f32 %v2084_v5, %v82_v8  ;;  %v2219_v8 = vmov 1934713408  }
  0x1c   :  { %v2291_v10 = vsel %vm84_vm1, %v2084_v5, %v83_v9  ;;  %v219_v9 = vunpack.c.l.s4 %v2219_v8 }
  0x81   :  { %v75_v11 = vpop.xlane.xlu0 %74 }
  0x82   :  { %v86_v12 = vmul.f32 %v2291_v10, %v75_v11 }
  0x84   :  { %v88_v13 = vsub.f32 %v68_v0, %v86_v12  ;;  %v2218_v0 = vmov 1983009808  }
  0x85   :  { %v195_v1 = vunpack.c.l.s4 %v2218_v0 }
  0x86   :  { %v90_v14 = vmul.f32 %v88_v13, %v88_v13 }
  0x87   :  { %v2342_v5 = vunpack.c.0.s8 %v195_v1 }
  0x88   :  { %v92_v15 = vsel %vm72_vm0, %v90_v14, 0.0 }
  0x89   :  { %93 = vadd.xlane.f32.xlu1 %v92_v15  ;;  %v78_v16 = vpop.xlane.xlu0 %77 }
  0x8a   :  { %v87_v17 = vmul.f32 %v2291_v10, %v78_v16 }
  0x8c   :  { %v89_v18 = vsub.f32 %v69_v2, %v87_v17  ;;  %v2356_v17 = vunpack.c.0.s8 %v219_v9 }
  0x8e   :  { %v91_v19 = vmul.f32 %v89_v18, %v89_v18 }
  0x90   :  { %v95_v20 = vsel %vm72_vm0, %v91_v19, 0.0 }
  0x91   :  { %96 = vadd.xlane.f32.xlu1 %v95_v20 }
  0xfc   :  { %v94_v25 = vpop.xlane.xlu1 %93 }
  0xfd   :  { %v98_v26 = vmul.f32 %v94_v25, %v2291_v10 }
  0xff   :  { %v100_v27 = vadd.f32 1e-05, %v98_v26 }
 0x101   :  { %2085 = vrsqrt.f32 %v100_v27  ;;  %vm108_vm3 = vweird.f32 %v100_v27 }
 0x104   :  { %v97_v28 = vpop.xlane.xlu1 %96 }
 0x105   :  { %v99_v29 = vmul.f32 %v97_v28, %v2291_v10 }
 0x107   :  { %v2086_v30 = vpop.eup %2085  ;;  %v101_v31 = vadd.f32 1e-05, %v99_v29 }
 0x108   :  { %v103_v32 = vmul.f32 %v2086_v30, %v100_v27  ;;  %vm109_vm2 = vweird.f32 %v2086_v30 }
 0x109   :  { %2087 = vrsqrt.f32 %v101_v31  ;;  %vm110_vm4 = vmor %vm108_vm3, %vm109_vm2  ;;  %vm118_vm5 = vweird.f32 %v101_v31  ;;  %vm1957_vm3 = vcmask 523264  }
 0x10a   :  { %v104_v33 = vmul.f32 %v2086_v30, %v103_v32 }
 0x10c   :  { %v105_v34 = vmul.f32 0.5, %v104_v33 }
 0x10e   :  { %v106_v35 = vsub.f32 1.5, %v105_v34 }
 0x10f   :  { %v2088_v37 = vpop.eup %2087 }
 0x110   :  { %v107_v38 = vmul.f32 %v2086_v30, %v106_v35  ;;  %v113_v39 = vmul.f32 %v2088_v37, %v101_v31  ;;  %vm119_vm6 = vweird.f32 %v2088_v37 }
 0x111   :  { %vm120_vm7 = vmor %vm118_vm5, %vm119_vm6 }
 0x112   :  { %v111_v41 = vsel %vm110_vm4, %v2086_v30, %v107_v38  ;;  %v114_v42 = vmul.f32 %v2088_v37, %v113_v39 }
 0x113   :  { %v122_v43 = vmul.f32 %v111_v41, %v88_v13 }
 0x114   :  { %v115_v45 = vmul.f32 0.5, %v114_v42 }
 0x115   :  { %v126_v46 = vmul.f32 %v124_v40, %v122_v43 }
 0x116   :  { %v116_v47 = vsub.f32 1.5, %v115_v45 }
 0x117   :  { %v130_v49 = vadd.f32 %v128_v44, %v126_v46 }
 0x118   :  { %v117_v50 = vmul.f32 %v2088_v37, %v116_v47 }
 0x119   :  { %2011 = vmatmul.msk.f32.vlgmr.msra.gmra.mxu0 %vm72_vm0, %v130_v49 }
 0x11a   :  { %v121_v52 = vsel %vm120_vm7, %v2088_v37, %v117_v50 }
 0x11b   :  { %v123_v53 = vmul.f32 %v121_v52, %v89_v18 }
 0x11d   :  { %v127_v55 = vmul.f32 %v125_v51, %v123_v53 }
 0x11f   :  { %v131_v56 = vadd.f32 %v129_v54, %v127_v55 }
 0x121   :  { %2012 = vmatmul.msk.f32.gmra.mxu0 %vm72_vm0, %v131_v56 }
 0x196   :  { %v163_v58 = vpop.f32.mrf.mxu0 }
 0x197   :  { %v2316_v59 = vadd.f32 %v2079_v57, %v163_v58 }
 0x199   :  { %183 = vrot.lane.b32.xlu0 %v2316_v59, %s2214_s14  ;;  %171 = vrot.lane.b32.xlu2 %v2316_v59, %s2215_s15  ;;  %v192_v4 = vrot.slane %v2316_v59, 4 }
 0x19e   :  { %v166_v60 = vpop.f32.mrf.mxu0 }
 0x19f   :  { %v2320_v61 = vadd.f32 %v2079_v57, %v166_v60 }
 0x1a1   :  { %177 = vrot.lane.b32.xlu2 %v2316_v59, %s2216_s16  ;;  %173 = vrot.lane.b32.xlu1 %v2320_v61, %s2215_s15  ;;  %v248_v24 = vrot.slane %v2320_v61, 4 }
 0x1a9   :  { %179 = vrot.lane.b32.xlu2 %v2320_v61, %s2216_s16 }
 0x1b1   :  { %185 = vrot.lane.b32.xlu2 %v2320_v61, %s2214_s14 }
 0x1b9   :  { %410 = vrot.lane.b32.xlu2 %v2316_v59, %s2217_s3 }
 0x1f3   :  { %v2328_v62 = vpop.permute.xlu2 %171 }
 0x1f4   :  { %414 = vrot.lane.b32.xlu0 %v2328_v62, %s2217_s3  ;;  %v204_v12 = vrot.slane %v2328_v62, 4 }
 0x1fb   :  { %v2332_v63 = vpop.permute.xlu2 %177 }
 0x1fc   :  { %412 = vrot.lane.b32.xlu0 %v2320_v61, %s2217_s3  ;;  %418 = vrot.lane.b32.xlu2 %v2332_v63, %s2217_s3  ;;  %v189_v2 = vrot.slane %v2332_v63, 4  ;;  %v193_v6 = vsel %vm190_vm8, %v2332_v63, %v192_v4 }
 0x1fd   :  { %v201_v11 = vperm.slane %v193_v6, %v2342_v5 }
 0x1fe   :  { %v191_v7 = vsel %vm190_vm8, %v189_v2, %v2316_v59 }
 0x1ff   :  { %v197_v13 = vperm.slane %v191_v7, %v2342_v5  ;;  %v228_v20 = vrot.slane %v201_v11, 4 }
 0x201   :  { %v216_v23 = vrot.slane %v197_v13, 4 }
 0x203   :  { %v2339_v3 = vpop.permute.xlu2 %179 }
 0x204   :  { %v246_v14 = vrot.slane %v2339_v3, 4  ;;  %v249_v31 = vsel %vm190_vm8, %v2339_v3, %v248_v24 }
 0x205   :  { %v257_v42 = vperm.slane %v249_v31, %v2342_v5 }
 0x206   :  { %v247_v26 = vsel %vm190_vm8, %v246_v14, %v2320_v61 }
 0x207   :  { %v253_v35 = vperm.slane %v247_v26, %v2342_v5  ;;  %v284_v52 = vrot.slane %v257_v42, 4 }
 0x209   :  { %v272_v46 = vrot.slane %v253_v35, 4 }
 0x20b   :  { %v2352_v15 = vpop.permute.xlu2 %185  ;;  %v2354_v16 = vpop.permute.xlu0 %183 }
 0x20c   :  { %v202_v18 = vrot.slane %v2354_v16, 4  ;;  %v205_v19 = vsel %vm190_vm8, %v2354_v16, %v204_v12  ;;  %424 = vrot.lane.b32.xlu0 %v2352_v15, %s2217_s3  ;;  %422 = vrot.lane.b32.xlu1 %v2354_v16, %s2217_s3  ;;  %v2074_v22 = vpack.i.bf16 %v2352_v15, %v2339_v3  ;;  %v258_v38 = vrot.slane %v2352_v15, 4 }
 0x20d   :  { %v213_v21 = vperm.slane %v205_v19, %v2342_v5 }
 0x20e   :  { %v203_v25 = vsel %vm190_vm8, %v202_v18, %v2328_v62 }
 0x20f   :  { %v209_v27 = vperm.slane %v203_v25, %v2342_v5  ;;  %v226_v28 = vrot.slane %v213_v21, 4  ;;  %v229_v29 = vsel %vm190_vm8, %v213_v21, %v228_v20 }
 0x210   :  { %v237_v30 = vperm.slane %v229_v29, %v2356_v17 }
 0x211   :  { %v214_v32 = vrot.slane %v209_v27, 4  ;;  %v217_v33 = vsel %vm190_vm8, %v209_v27, %v216_v23  ;;  %v227_v34 = vsel %vm190_vm8, %v226_v28, %v201_v11 }
 0x212   :  { %v225_v36 = vperm.slane %v217_v33, %v2356_v17  ;;  %v244_v37 = vrot.slane %v237_v30, 4  ;;  %v233_v40 = vperm.slane %v227_v34, %v2356_v17 }
 0x213   :  { %v215_v39 = vsel %vm190_vm8, %v214_v32, %v197_v13  ;;  %v2385_v41 = vpop.permute.xlu1 %173 }
 0x214   :  { %416 = vrot.lane.b32.xlu2 %v2385_v41, %s2217_s3  ;;  %420 = vrot.lane.b32.xlu1 %v2339_v3, %s2217_s3  ;;  %v240_v43 = vrot.slane %v225_v36, 4  ;;  %v259_v44 = vsel %vm190_vm8, %v258_v38, %v2385_v41  ;;  %v260_v45 = vrot.slane %v2385_v41, 4  ;;  %v221_v47 = vperm.slane %v215_v39, %v2356_v17 }
 0x215   :  { %v245_v48 = vsel %vm190_vm8, 0.0, %v244_v37  ;;  %v265_v49 = vperm.slane %v259_v44, %v2342_v5  ;;  %v242_v50 = vrot.slane %v233_v40, 4  ;;  %v313_v31 = vsel %vm190_vm8, %v244_v37, %v233_v40 }
 0x216   :  { %v261_v51 = vsel %vm190_vm8, %v2352_v15, %v260_v45  ;;  %v241_v56 = vsel %vm190_vm8, 0.0, %v240_v43  ;;  %v318_v57 = vrot.slane %v245_v48, 4  ;;  %v238_v2 = vrot.slane %v221_v47, 4 }
 0x217   :  { %v269_v53 = vperm.slane %v261_v51, %v2342_v5  ;;  %v270_v54 = vrot.slane %v265_v49, 4  ;;  %v273_v55 = vsel %vm190_vm8, %v265_v49, %v272_v46  ;;  %v243_v4 = vsel %vm190_vm8, 0.0, %v242_v50 }
 0x218   :  { %v281_v58 = vperm.slane %v273_v55, %v2356_v17  ;;  %v307_v9 = vrot.slane %v241_v56, 4  ;;  %v239_v21 = vsel %vm190_vm8, 0.0, %v238_v2  ;;  %v319_v23 = vsel %vm190_vm8, %v318_v57, %v243_v4 }
 0x219   :  { %v271_v60 = vsel %vm190_vm8, %v270_v54, %v253_v35  ;;  %v282_v0 = vrot.slane %v269_v53, 4  ;;  %v285_v1 = vsel %vm190_vm8, %v269_v53, %v284_v52  ;;  %v323_v39 = vperm.slane %v319_v23, %v2342_v5 }
 0x21a   :  { %v277_v6 = vperm.slane %v271_v60, %v2356_v17  ;;  %v293_v7 = vperm.slane %v285_v1, %v2356_v17  ;;  %v296_v8 = vrot.slane %v281_v58, 4  ;;  %v308_v38 = vsel %vm190_vm8, %v307_v9, %v239_v21 }
 0x21b   :  { %v283_v11 = vsel %vm190_vm8, %v282_v0, %v257_v42  ;;  %v317_v37 = vperm.slane %v313_v31, %v2342_v5  ;;  %v302_v40 = vsel %vm190_vm8, %v240_v43, %v221_v47  ;;  %v312_v46 = vperm.slane %v308_v38, %v2342_v5 }
 0x21c   :  { %v289_v12 = vperm.slane %v283_v11, %v2356_v17  ;;  %v294_v13 = vrot.slane %v277_v6, 4  ;;  %v297_v14 = vsel %vm190_vm8, 0.0, %v296_v8  ;;  %v300_v18 = vrot.slane %v293_v7, 4 }
 0x21d   :  { %v356_v19 = vsel %vm190_vm8, %v296_v8, %v277_v6  ;;  %v361_v20 = vrot.slane %v297_v14, 4  ;;  %v336_v50 = vrot.slane %v323_v39, 4  ;;  %v306_v52 = vperm.slane %v302_v40, %v2342_v5 }
 0x21e   :  { %v295_v24 = vsel %vm190_vm8, 0.0, %v294_v13  ;;  %v298_v25 = vrot.slane %v289_v12, 4  ;;  %v301_v26 = vsel %vm190_vm8, 0.0, %v300_v18  ;;  %v360_v27 = vperm.slane %v356_v19, %v2342_v5 }
 0x21f   :  { %v362_v28 = vsel %vm190_vm8, %v361_v20, %v295_v24  ;;  %v367_v29 = vsel %vm190_vm8, %v300_v18, %v289_v12  ;;  %v372_v30 = vrot.slane %v301_v26, 4  ;;  %v338_v53 = vrot.slane %v317_v37, 4 }
 0x220   :  { %v299_v32 = vsel %vm190_vm8, 0.0, %v298_v25  ;;  %v366_v33 = vperm.slane %v362_v28, %v2342_v5  ;;  %v371_v34 = vperm.slane %v367_v29, %v2342_v5  ;;  %v380_v35 = vrot.slane %v360_v27, 4 }
 0x221   :  { %v373_v36 = vsel %vm190_vm8, %v372_v30, %v299_v32  ;;  %v324_v55 = vrot.slane %v312_v46, 4  ;;  %v337_v58 = vsel %vm190_vm8, %v336_v50, %v317_v37  ;;  %v326_v47 = vrot.slane %v306_v52, 4 }
 0x222   :  { %v377_v42 = vperm.slane %v373_v36, %v2342_v5  ;;  %v381_v44 = vsel %vm190_vm8, %v366_v33, %v380_v35  ;;  %v392_v45 = vrot.slane %v371_v34, 4  ;;  %v378_v48 = vrot.slane %v366_v33, 4 }
 0x223   :  { %v389_v49 = vperm.slane %v381_v44, %v2356_v17  ;;  %v339_v60 = vsel %vm190_vm8, %v323_v39, %v338_v53  ;;  %v343_v2 = vperm.slane %v337_v58, %v2356_v17  ;;  %v325_v7 = vsel %vm190_vm8, %v324_v55, %v306_v52 }
 0x224   :  { %v393_v51 = vsel %vm190_vm8, %v377_v42, %v392_v45  ;;  %v379_v54 = vsel %vm190_vm8, %v378_v48, %v360_v27  ;;  %v390_v0 = vrot.slane %v377_v42, 4  ;;  %v347_v8 = vperm.slane %v339_v60, %v2356_v17  ;;  %v411_v48 = vpop.permute.xlu2 %410 }
 0x225   :  { %v401_v56 = vperm.slane %v393_v51, %v2356_v17  ;;  %v408_v57 = vrot.slane %v389_v49, 4  ;;  %v385_v43 = vperm.slane %v379_v54, %v2356_v17  ;;  %v327_v11 = vsel %vm190_vm8, %v312_v46, %v326_v47 }
 0x226   :  { %v391_v4 = vsel %vm190_vm8, %v390_v0, %v371_v34  ;;  %v331_v14 = vperm.slane %v325_v7, %v2356_v17  ;;  %v348_v18 = vrot.slane %v343_v2, 4  ;;  %v335_v19 = vperm.slane %v327_v11, %v2356_v17 }
 0x227   :  { %v404_v1 = vrot.slane %v385_v43, 4  ;;  %v2443_v6 = vsel %vm190_vm8, %v401_v56, %v408_v57  ;;  %v397_v9 = vperm.slane %v391_v4, %v2356_v17  ;;  %v352_v20 = vrot.slane %v347_v8, 4 }
 0x228   :  { %v905_v13 = vmul.f32 %v2443_v6, %v2443_v6  ;;  %v2458_v23 = vsel %vm190_vm8, %v348_v18, %v331_v14  ;;  %v350_v27 = vrot.slane %v331_v14, 4  ;;  %v354_v28 = vrot.slane %v335_v19, 4 }
 0x229   :  { %v2450_v12 = vsel %vm190_vm8, %v397_v9, %v404_v1  ;;  %v2461_v24 = vsel %vm190_vm8, %v352_v20, %v335_v19  ;;  %v898_v25 = vmul.f32 %v2458_v23, %v2458_v23  ;;  %v406_v35 = vrot.slane %v401_v56, 4 }
 0x22a   :  { %v928_v21 = vsel %vm906_vm9, %v905_v13, 0.0  ;;  %v900_v26 = vmul.f32 %v2461_v24, %v2461_v24  ;;  %v2470_v31 = vsel %vm190_vm8, %v343_v2, %v350_v27  ;;  %v2473_v32 = vsel %vm190_vm8, %v347_v8, %v354_v28 }
 0x22b   :  { %v907_v29 = vsel %vm906_vm9, %v898_v25, 0.0  ;;  %v899_v33 = vmul.f32 %v2470_v31, %v2470_v31  ;;  %v901_v34 = vmul.f32 %v2473_v32, %v2473_v32  ;;  %v402_v36 = vrot.slane %v397_v9, 4 }
 0x22c   :  { %v913_v30 = vsel %vm906_vm9, %v900_v26, 0.0  ;;  %v2482_v42 = vsel %vm190_vm8, %v406_v35, %v389_v49  ;;  %v436_v53 = vrot.slane %v411_v48, 4 }
 0x22d   :  { %v910_v38 = vsel %vm906_vm9, %v899_v33, 0.0  ;;  %v916_v39 = vsel %vm906_vm9, %v901_v34, 0.0  ;;  %v2485_v44 = vsel %vm190_vm8, %v402_v36, %v385_v43  ;;  %v904_v45 = vmul.f32 %v2482_v42, %v2482_v42 }
 0x22e   :  { %v902_v37 = vmul.f32 %v2485_v44, %v2485_v44 }
 0x22f   :  { %v925_v40 = vsel %vm906_vm9, %v904_v45, 0.0 }
 0x230   :  { %v919_v46 = vsel %vm906_vm9, %v902_v37, 0.0 }
 0x236   :  { %929 = vadd.xlane.f32.xlu0 %v928_v21 }
 0x23d   :  { %908 = vadd.xlane.f32.xlu2 %v907_v29 }
 0x23e   :  { %914 = vadd.xlane.f32.xlu1 %v913_v30 }
 0x245   :  { %911 = vadd.xlane.f32.xlu2 %v910_v38 }
 0x246   :  { %917 = vadd.xlane.f32.xlu1 %v916_v39 }
 0x24d   :  { %926 = vadd.xlane.f32.xlu2 %v925_v40 }
 0x24e   :  { %920 = vadd.xlane.f32.xlu1 %v919_v46 }
 0x256   :  { %v419_v49 = vpop.permute.xlu2 %418 }
 0x257   :  { %v434_v51 = vrot.slane %v419_v49, 4  ;;  %v437_v54 = vsel %vm190_vm8, %v419_v49, %v436_v53 }
 0x258   :  { %v445_v57 = vperm.slane %v437_v54, %v2342_v5 }
 0x259   :  { %v435_v55 = vsel %vm190_vm8, %v434_v51, %v411_v48 }
 0x25a   :  { %v441_v58 = vperm.slane %v435_v55, %v2342_v5  ;;  %v472_v8 = vrot.slane %v445_v57, 4 }
 0x25c   :  { %v460_v11 = vrot.slane %v441_v58, 4 }
 0x266   :  { %v415_v50 = vpop.permute.xlu0 %414 }
 0x267   :  { %v448_v43 = vrot.slane %v415_v50, 4 }
 0x26e   :  { %v413_v52 = vpop.permute.xlu0 %412  ;;  %v417_v56 = vpop.permute.xlu2 %416 }
 0x26f   :  { %v504_v47 = vrot.slane %v417_v56, 4  ;;  %v492_v35 = vrot.slane %v413_v52, 4 }
 0x27e   :  { %v423_v60 = vpop.permute.xlu1 %422  ;;  %v425_v0 = vpop.permute.xlu0 %424 }
 0x27f   :  { %v446_v1 = vrot.slane %v423_v60, 4  ;;  %v449_v2 = vsel %vm190_vm8, %v423_v60, %v448_v43  ;;  %v502_v4 = vrot.slane %v425_v0, 4  ;;  %v505_v7 = vsel %vm190_vm8, %v425_v0, %v504_v47 }
 0x280   :  { %v457_v9 = vperm.slane %v449_v2, %v2342_v5  ;;  %v513_v18 = vperm.slane %v505_v7, %v2342_v5 }
 0x281   :  { %v447_v13 = vsel %vm190_vm8, %v446_v1, %v415_v50  ;;  %v503_v14 = vsel %vm190_vm8, %v502_v4, %v417_v56 }
 0x282   :  { %v453_v19 = vperm.slane %v447_v13, %v2342_v5  ;;  %v470_v20 = vrot.slane %v457_v9, 4  ;;  %v473_v21 = vsel %vm190_vm8, %v457_v9, %v472_v8  ;;  %v509_v25 = vperm.slane %v503_v14, %v2342_v5 }
 0x283   :  { %v481_v26 = vperm.slane %v473_v21, %v2356_v17  ;;  %v526_v39 = vrot.slane %v513_v18, 4 }
 0x284   :  { %v458_v27 = vrot.slane %v453_v19, 4  ;;  %v461_v28 = vsel %vm190_vm8, %v453_v19, %v460_v11  ;;  %v471_v29 = vsel %vm190_vm8, %v470_v20, %v445_v57  ;;  %v514_v38 = vrot.slane %v509_v25, 4 }
 0x285   :  { %v469_v30 = vperm.slane %v461_v28, %v2356_v17  ;;  %v477_v33 = vperm.slane %v471_v29, %v2356_v17  ;;  %v488_v34 = vrot.slane %v481_v26, 4 }
 0x286   :  { %v459_v36 = vsel %vm190_vm8, %v458_v27, %v441_v58  ;;  %v421_v45 = vpop.permute.xlu1 %420 }
 0x287   :  { %v465_v37 = vperm.slane %v459_v36, %v2356_v17  ;;  %v484_v40 = vrot.slane %v469_v30, 4  ;;  %v486_v46 = vrot.slane %v477_v33, 4  ;;  %v489_v48 = vsel %vm190_vm8, 0.0, %v488_v34 }
 0x288   :  { %v557_v50 = vsel %vm190_vm8, %v488_v34, %v477_v33  ;;  %v562_v49 = vrot.slane %v489_v48, 4  ;;  %v490_v51 = vrot.slane %v421_v45, 4  ;;  %v493_v53 = vsel %vm190_vm8, %v421_v45, %v492_v35 }
 0x289   :  { %v485_v54 = vsel %vm190_vm8, 0.0, %v484_v40  ;;  %v487_v55 = vsel %vm190_vm8, 0.0, %v486_v46  ;;  %v561_v56 = vperm.slane %v557_v50, %v2342_v5  ;;  %v501_v57 = vperm.slane %v493_v53, %v2342_v5 }
 0x28a   :  { %v551_v58 = vrot.slane %v485_v54, 4  ;;  %v491_v43 = vsel %vm190_vm8, %v490_v51, %v413_v52  ;;  %v482_v47 = vrot.slane %v465_v37, 4  ;;  %v546_v60 = vsel %vm190_vm8, %v484_v40, %v465_v37 }
 0x28b   :  { %v497_v0 = vperm.slane %v491_v43, %v2342_v5  ;;  %v527_v1 = vsel %vm190_vm8, %v526_v39, %v501_v57  ;;  %v528_v2 = vrot.slane %v501_v57, 4  ;;  %v550_v4 = vperm.slane %v546_v60, %v2342_v5 }
 0x28c   :  { %v533_v7 = vperm.slane %v527_v1, %v2356_v17  ;;  %v483_v8 = vsel %vm190_vm8, 0.0, %v482_v47  ;;  %v563_v9 = vsel %vm190_vm8, %v562_v49, %v487_v55  ;;  %v582_v11 = vrot.slane %v561_v56, 4 }
 0x28d   :  { %v515_v13 = vsel %vm190_vm8, %v514_v38, %v497_v0  ;;  %v516_v52 = vrot.slane %v497_v0, 4  ;;  %v529_v14 = vsel %vm190_vm8, %v513_v18, %v528_v2  ;;  %v552_v19 = vsel %vm190_vm8, %v551_v58, %v483_v8 }
 0x28e   :  { %v521_v20 = vperm.slane %v515_v13, %v2356_v17  ;;  %v537_v21 = vperm.slane %v529_v14, %v2356_v17  ;;  %v542_v26 = vrot.slane %v533_v7, 4  ;;  %v556_v27 = vperm.slane %v552_v19, %v2342_v5 }
 0x28f   :  { %v517_v28 = vsel %vm190_vm8, %v509_v25, %v516_v52  ;;  %v567_v29 = vperm.slane %v563_v9, %v2342_v5  ;;  %v570_v30 = vrot.slane %v550_v4, 4 }
 0x290   :  { %v525_v33 = vperm.slane %v517_v28, %v2356_v17  ;;  %v538_v34 = vrot.slane %v521_v20, 4  ;;  %v543_v35 = vsel %vm190_vm8, 0.0, %v542_v26  ;;  %v544_v18 = vrot.slane %v537_v21, 4 }
 0x291   :  { %v571_v36 = vsel %vm190_vm8, %v556_v27, %v570_v30  ;;  %v583_v38 = vsel %vm190_vm8, %v567_v29, %v582_v11  ;;  %v568_v39 = vrot.slane %v556_v27, 4  ;;  %v580_v45 = vrot.slane %v567_v29, 4 }
 0x292   :  { %v540_v37 = vrot.slane %v525_v33, 4  ;;  %v545_v40 = vsel %vm190_vm8, 0.0, %v544_v18  ;;  %v611_v25 = vsel %vm190_vm8, %v544_v18, %v533_v7  ;;  %v579_v46 = vperm.slane %v571_v36, %v2356_v17 }
 0x293   :  { %v615_v48 = vperm.slane %v611_v25, %v2342_v5  ;;  %v616_v50 = vrot.slane %v545_v40, 4  ;;  %v591_v49 = vperm.slane %v583_v38, %v2356_v17  ;;  %v569_v51 = vsel %vm190_vm8, %v568_v39, %v550_v4 }
 0x294   :  { %v541_v53 = vsel %vm190_vm8, 0.0, %v540_v37  ;;  %v575_v54 = vperm.slane %v569_v51, %v2356_v17  ;;  %v581_v55 = vsel %vm190_vm8, %v580_v45, %v561_v56  ;;  %v598_v57 = vrot.slane %v579_v46, 4 }
 0x295   :  { %v617_v58 = vsel %vm190_vm8, %v616_v50, %v543_v35  ;;  %v596_v43 = vrot.slane %v591_v49, 4  ;;  %v587_v47 = vperm.slane %v581_v55, %v2356_v17  ;;  %v539_v60 = vsel %vm190_vm8, 0.0, %v538_v34 }
 0x296   :  { %v599_v0 = vsel %vm190_vm8, %v591_v49, %v598_v57  ;;  %v594_v1 = vrot.slane %v575_v54, 4  ;;  %v600_v2 = vsel %vm190_vm8, %v540_v37, %v521_v20  ;;  %v605_v4 = vrot.slane %v541_v53, 4 }
 0x297   :  { %v597_v7 = vsel %vm190_vm8, %v596_v43, %v579_v46  ;;  %v592_v8 = vrot.slane %v587_v47, 4  ;;  %v934_v9 = vmul.f32 %v599_v0, %v599_v0  ;;  %2019 = vmatpush.xpose.msk.msra.mxu1 %vm906_vm9, %v599_v0  ;;  %v604_v56 = vperm.slane %v600_v2, %v2342_v5 }
 0x298   :  { %v933_v11 = vmul.f32 %v597_v7, %v597_v7  ;;  %2017 = vmatpush.xpose.msk.msra.mxu3 %vm906_vm9, %v597_v7  ;;  %v595_v13 = vsel %vm190_vm8, %v587_v47, %v594_v1  ;;  %v606_v52 = vsel %vm190_vm8, %v605_v4, %v539_v60  ;;  %v621_v14 = vperm.slane %v617_v58, %v2342_v5 }
 0x299   :  { %v593_v19 = vsel %vm190_vm8, %v592_v8, %v575_v54  ;;  %v948_v20 = vsel %vm906_vm9, %v934_v9, 0.0  ;;  %v610_v21 = vperm.slane %v606_v52, %v2342_v5  ;;  %v624_v26 = vrot.slane %v604_v56, 4 }
 0x29a   :  { %2013 = vmatpush.xpose.msk.msra.mxu2 %vm906_vm9, %v593_v19  ;;  %v945_v27 = vsel %vm906_vm9, %v933_v11, 0.0  ;;  %2020 = vmatmul.msk.f32.vlgmr.msra.gmra.mxu1 %vm906_vm9, %v2473_v32  ;;  %v634_v28 = vrot.slane %v621_v14, 4  ;;  %v636_v29 = vrot.slane %v615_v48, 4  ;;  %v931_v38 = vmul.f32 %v593_v19, %v593_v19 }
 0x29b   :  { %2018 = vmatmul.msk.f32.vlgmr.msra.gmra.mxu3 %vm906_vm9, %v2461_v24  ;;  %946 = vadd.xlane.f32.xlu0 %v945_v27  ;;  %v622_v30 = vrot.slane %v610_v21, 4  ;;  %v625_v33 = vsel %vm190_vm8, %v610_v21, %v624_v26  ;;  %v932_v25 = vmul.f32 %v595_v13, %v595_v13  ;;  %v2059_v1 = vpack.i.bf16 %v2328_v62, %v2316_v59 }
 0x29c   :  { %949 = vadd.xlane.f32.xlu2 %v948_v20  ;;  %v633_v34 = vperm.slane %v625_v33, %v2356_v17  ;;  %v637_v35 = vsel %vm190_vm8, %v621_v14, %v636_v29  ;;  %v635_v18 = vsel %vm190_vm8, %v634_v28, %v615_v48  ;;  %v1211_v11 = vlaneseq }
 0x29d   :  { %2014 = vmatmul.msk.f32.vlgmr.msra.gmra.mxu2 %vm906_vm9, %v2458_v23  ;;  %v645_v32 = vperm.slane %v637_v35, %v2356_v17  ;;  %v623_v24 = vsel %vm190_vm8, %v622_v30, %v604_v56  ;;  %v641_v36 = vperm.slane %v635_v18, %v2356_v17  ;;  %v939_v23 = vsel %vm906_vm9, %v931_v38, 0.0 }
 0x29e   :  { %2015 = vmatpush.xpose.msk.msrb.mxu2 %vm906_vm9, %v595_v13  ;;  %v629_v39 = vperm.slane %v623_v24, %v2356_v17  ;;  %v652_v37 = vrot.slane %v633_v34, 4  ;;  %v942_v53 = vsel %vm906_vm9, %v932_v25, 0.0 }
 0x29f   :  { %v650_v45 = vrot.slane %v645_v32, 4  ;;  %v646_v40 = vrot.slane %v641_v36, 4 }
 0x2a0   :  { %v648_v46 = vrot.slane %v629_v39, 4  ;;  %v653_v54 = vsel %vm190_vm8, %v645_v32, %v652_v37 }
 0x2a1   :  { %v651_v50 = vsel %vm190_vm8, %v650_v45, %v633_v34  ;;  %v647_v48 = vsel %vm190_vm8, %v646_v40, %v629_v39  ;;  %v938_v57 = vmul.f32 %v653_v54, %v653_v54 }
 0x2a2   :  { %2025 = vmatpush.xpose.msk.msrb.mxu1 %vm906_vm9, %v651_v50  ;;  %2021 = vmatpush.xpose.msk.msra.mxu2 %vm906_vm9, %v647_v48  ;;  %v937_v49 = vmul.f32 %v651_v50, %v651_v50  ;;  %v649_v51 = vsel %vm190_vm8, %v641_v36, %v648_v46  ;;  %v935_v43 = vmul.f32 %v647_v48, %v647_v48 }
 0x2a3   :  { %940 = vadd.xlane.f32.xlu0 %v939_v23  ;;  %2023 = vmatpush.xpose.msk.msrb.mxu3 %vm906_vm9, %v649_v51  ;;  %v936_v58 = vmul.f32 %v649_v51, %v649_v51  ;;  %v960_v47 = vsel %vm906_vm9, %v938_v57, 0.0 }
 0x2a4   :  { %943 = vadd.xlane.f32.xlu2 %v942_v53  ;;  %v957_v55 = vsel %vm906_vm9, %v937_v49, 0.0 }
 0x2a5   :  { %2016 = vmatmul.msk.f32.vlgmr.msrb.gmra.mxu2 %vm906_vm9, %v2470_v31  ;;  %2026 = vmatmul.msk.f32.vlgmr.msrb.gmra.mxu1 %vm906_vm9, %v2482_v42  ;;  %v954_v60 = vsel %vm906_vm9, %v936_v58, 0.0  ;;  %v951_v31 = vsel %vm906_vm9, %v935_v43, 0.0  ;;  %v903_v42 = vmul.f32 %v2450_v12, %v2450_v12 }
 0x2a6   :  { %958 = vadd.xlane.f32.xlu1 %v957_v55  ;;  %2027 = vmatpush.xpose.msk.msrb.mxu2 %vm906_vm9, %v653_v54 }
 0x2a7   :  { %2024 = vmatmul.msk.f32.vlgmr.msrb.gmra.mxu3 %vm906_vm9, %v2450_v12  ;;  %v922_v0 = vsel %vm906_vm9, %v903_v42, 0.0 }
 0x2ab   :  { %961 = vadd.xlane.f32.xlu0 %v960_v47 }
 0x2ac   :  { %955 = vadd.xlane.f32.xlu2 %v954_v60 }
 0x2ad   :  { %2022 = vmatmul.msk.f32.vlgmr.msra.gmra.mxu2 %vm906_vm9, %v2485_v44  ;;  %v2611_v44 = vpop.xlane.xlu0 %929 }
 0x2ae   :  { %952 = vadd.xlane.f32.xlu1 %v951_v31 }
 0x2b0   :  { %v909_v2 = vpop.xlane.xlu2 %908 }
 0x2b1   :  { %v915_v7 = vpop.xlane.xlu1 %914  ;;  %v1179_v24 = vmul.f32 0.35355338, %v909_v2 }
 0x2b2   :  { %v1181_v34 = vmul.f32 0.35355338, %v915_v7 }
 0x2b3   :  { %923 = vadd.xlane.f32.xlu0 %v922_v0 }
 0x2b5   :  { %2028 = vmatmul.msk.f32.vlgmr.msrb.gmra.mxu2 %vm906_vm9, %v2443_v6  ;;  %v2613_v6 = vand.u32 127, %v1211_v11 }
 0x2b8   :  { %v912_v4 = vpop.xlane.xlu2 %911 }
 0x2b9   :  { %v918_v56 = vpop.xlane.xlu1 %917  ;;  %v1180_v7 = vmul.f32 0.35355338, %v912_v4 }
 0x2ba   :  { %v1182_v19 = vmul.f32 0.35355338, %v918_v56 }
 0x2c0   :  { %v927_v8 = vpop.xlane.xlu2 %926 }
 0x2c1   :  { %v921_v59 = vpop.xlane.xlu1 %920  ;;  %v1185_v48 = vmul.f32 0.35355338, %v927_v8 }
 0x2c4   :  { %2060 = vrot.lane.b32.xlu2 %v2059_v1, %s2211_s25 }
 0x30e   :  { %v947_v9 = vpop.xlane.xlu0 %946 }
 0x30f   :  { %v950_v12 = vpop.xlane.xlu2 %949  ;;  %v1197_v28 = vmul.f32 0.35355338, %v947_v9 }
 0x310   :  { %v1198_v13 = vmul.f32 0.35355338, %v950_v12 }
 0x311   :  { %v1215_v36 = vperm.slane %v1197_v28, %v2613_v6 }
 0x312   :  { %v1216_v62 = vperm.slane %v1198_v13, %v2613_v6 }
 0x316   :  { %v941_v52 = vpop.xlane.xlu0 %940 }
 0x317   :  { %v1064_v14 = vpop.f32.mrf.mxu1  ;;  %v944_v26 = vpop.xlane.xlu2 %943  ;;  %v1195_v35 = vmul.f32 0.35355338, %v941_v52 }
 0x318   :  { %v1174_v20 = vmul.f32 0.70710677, %v1064_v14  ;;  %v1196_v8 = vmul.f32 0.35355338, %v944_v26 }
 0x319   :  { %v959_v45 = vpop.xlane.xlu1 %958  ;;  %v1213_v40 = vperm.slane %v1195_v35, %v2613_v6 }
 0x31a   :  { %v1190_v21 = vsub.f32 %v1174_v20, %v1182_v19  ;;  %v1201_v23 = vmul.f32 0.35355338, %v959_v45  ;;  %v1183_v19 = vmul.f32 0.35355338, %v921_v59  ;;  %v1214_v20 = vperm.slane %v1196_v8, %v2613_v6 }
 0x31b   :  { %v2064_v45 = vpack.i.bf16 %v2354_v16, %v2332_v63 }
 0x31c   :  { %v2616_v27 = vsub.f32 %v1190_v21, %v1216_v62  ;;  %v1219_v43 = vperm.slane %v1201_v23, %v2613_v6 }
 0x31e   :  { %v1038_v29 = vpop.f32.mrf.mxu3  ;;  %v962_v30 = vpop.xlane.xlu0 %961  ;;  %v1300_v33 = vsel %vm906_vm9, %v2616_v27, -inf }
 0x31f   :  { %v1173_v18 = vmul.f32 0.70710677, %v1038_v29  ;;  %1301 = vmax.xlane.f32.xlu0 %v1300_v33  ;;  %v956_v53 = vpop.xlane.xlu2 %955  ;;  %v1202_v33 = vmul.f32 0.35355338, %v962_v30  ;;  %v2069_v30 = vpack.i.bf16 %v2385_v41, %v2320_v61 }
 0x320   :  { %v986_v32 = vpop.f32.mrf.mxu2  ;;  %v1200_v47 = vmul.f32 0.35355338, %v956_v53 }
 0x321   :  { %v1189_v38 = vsub.f32 %v1173_v18, %v1181_v34  ;;  %v1171_v39 = vmul.f32 0.70710677, %v986_v32  ;;  %v953_v2 = vpop.xlane.xlu1 %952  ;;  %v1186_v18 = vmul.f32 0.35355338, %v2611_v44 }
 0x322   :  { %v1142_v37 = vpop.f32.mrf.mxu1  ;;  %v1218_v9 = vperm.slane %v1200_v47, %v2613_v6  ;;  %v1199_v12 = vmul.f32 0.35355338, %v953_v2 }
 0x323   :  { %v1187_v25 = vsub.f32 %v1171_v39, %v1179_v24  ;;  %v1177_v46 = vmul.f32 0.70710677, %v1142_v37  ;;  %v2622_v50 = vsub.f32 %v1189_v38, %v1215_v36  ;;  %v1220_v24 = vperm.slane %v1202_v33, %v2613_v6 }
 0x324   :  { %v1217_v21 = vperm.slane %v1199_v12, %v2613_v6 }
 0x325   :  { %v1297_v49 = vsel %vm906_vm9, %v2622_v50, -inf  ;;  %v2626_v51 = vsub.f32 %v1187_v25, %v1213_v40  ;;  %v1193_v54 = vsub.f32 %v1177_v46, %v1185_v48 }
 0x326   :  { %1298 = vmax.xlane.f32.xlu2 %v1297_v49  ;;  %v924_v57 = vpop.xlane.xlu0 %923 }
 0x327   :  { %v1291_v55 = vsel %vm906_vm9, %v2626_v51, -inf  ;;  %v1184_v31 = vmul.f32 0.35355338, %v924_v57  ;;  %v2631_v1 = vsub.f32 %v1193_v54, %v1219_v43  ;;  %v2657_v44 = vpop.permute.xlu2 %2060 }
 0x328   :  { %v1012_v58 = vpop.f32.mrf.mxu2  ;;  %1292 = vmax.xlane.f32.xlu1 %v1291_v55 }
 0x329   :  { %v1172_v42 = vmul.f32 0.70710677, %v1012_v58  ;;  %v1309_v13 = vsel %vm906_vm9, %v2631_v1, -inf }
 0x32a   :  { %v1116_v60 = vpop.f32.mrf.mxu3 }
 0x32b   :  { %v1176_v0 = vmul.f32 0.70710677, %v1116_v60  ;;  %v1188_v11 = vsub.f32 %v1172_v42, %v1180_v7 }
 0x32d   :  { %v1192_v56 = vsub.f32 %v1176_v0, %v1184_v31  ;;  %v1284_v28 = vsub.f32 %v1188_v11, %v1214_v20 }
 0x32f   :  { %v2636_v52 = vsub.f32 %v1192_v56, %v1218_v9  ;;  %v1294_v34 = vsel %vm906_vm9, %v1284_v28, -inf }
 0x330   :  { %v1090_v14 = vpop.f32.mrf.mxu2  ;;  %1310 = vmax.xlane.f32.xlu1 %v1309_v13 }
 0x331   :  { %v1175_v62 = vmul.f32 0.70710677, %v1090_v14  ;;  %v1306_v4 = vsel %vm906_vm9, %v2636_v52, -inf }
 0x332   :  { %1307 = vmax.xlane.f32.xlu0 %v1306_v4  ;;  %v2062_v4 = vunpack.i.l.bf16 %v2657_v44 }
 0x333   :  { %v1191_v26 = vsub.f32 %v1175_v62, %v1183_v19  ;;  %v2063_v62 = vunpack.i.h.bf16 %v2657_v44 }
 0x334   :  { %v680_v44 = vrot.slane %v2062_v4, 4 }
 0x335   :  { %v1287_v29 = vsub.f32 %v1191_v26, %v1217_v21 }
 0x337   :  { %v1303_v32 = vsel %vm906_vm9, %v1287_v29, -inf }
 0x338   :  { %v1168_v35 = vpop.f32.mrf.mxu2  ;;  %1295 = vmax.xlane.f32.xlu1 %v1294_v34 }
 0x339   :  { %v1178_v59 = vmul.f32 0.70710677, %v1168_v35 }
 0x33a   :  { %1304 = vmax.xlane.f32.xlu0 %v1303_v32 }
 0x33b   :  { %v1194_v36 = vsub.f32 %v1178_v59, %v1186_v18 }
 0x33d   :  { %v1290_v38 = vsub.f32 %v1194_v36, %v1220_v24 }
 0x33f   :  { %v1312_v39 = vsel %vm906_vm9, %v1290_v38, -inf }
 0x340   :  { %1313 = vmax.xlane.f32.xlu2 %v1312_v39 }
 0x34e   :  { %2070 = vrot.lane.b32.xlu0 %v2069_v30, %s2211_s25 }
 0x351   :  { %2065 = vrot.lane.b32.xlu1 %v2064_v45, %s2211_s25  ;;  %v692_v45 = vrot.slane %v2063_v62, 4 }
 0x358   :  { %2075 = vrot.lane.b32.xlu2 %v2074_v22, %s2211_s25 }
 0x392   :  { %v1302_v6 = vpop.xlane.xlu0 %1301 }
 0x393   :  { %v1318_v37 = vsub.f32 %v2616_v27, %v1302_v6 }
 0x395   :  { %v1329_v40 = vmul.f32 1.442695, %v1318_v37 }
 0x397   :  { %2089 = vpow2.f32 %v1329_v40 }
 0x399   :  { %v1299_v61 = vpop.xlane.xlu2 %1298 }
 0x39a   :  { %v1317_v41 = vsub.f32 %v2622_v50, %v1299_v61 }
 0x39b   :  { %v1293_v25 = vpop.xlane.xlu1 %1292 }
 0x39c   :  { %v1327_v46 = vmul.f32 1.442695, %v1317_v41  ;;  %v1315_v63 = vsub.f32 %v2626_v51, %v1293_v25 }
 0x39d   :  { %v2662_v16 = vpop.eup %2089 }
 0x39e   :  { %2091 = vpow2.f32 %v1327_v46  ;;  %v1323_v48 = vmul.f32 1.442695, %v1315_v63  ;;  %v1348_v3 = vsel %vm906_vm9, %v2662_v16, 0.0 }
 0x39f   :  { %1349 = vadd.xlane.f32.xlu1 %v1348_v3 }
 0x3a0   :  { %2093 = vpow2.f32 %v1323_v48 }
 0x3a3   :  { %v1311_v15 = vpop.xlane.xlu1 %1310 }
 0x3a4   :  { %v2666_v22 = vpop.eup %2091  ;;  %v1321_v55 = vsub.f32 %v2631_v1, %v1311_v15 }
 0x3a5   :  { %v1345_v27 = vsel %vm906_vm9, %v2666_v22, 0.0  ;;  %v1308_v50 = vpop.xlane.xlu0 %1307 }
 0x3a6   :  { %v2670_v23 = vpop.eup %2093  ;;  %1346 = vadd.xlane.f32.xlu2 %v1345_v27  ;;  %v1320_v43 = vsub.f32 %v2636_v52, %v1308_v50  ;;  %v1335_v60 = vmul.f32 1.442695, %v1321_v55 }
 0x3a7   :  { %v1339_v49 = vsel %vm906_vm9, %v2670_v23, 0.0 }
 0x3a8   :  { %1340 = vadd.xlane.f32.xlu0 %v1339_v49  ;;  %v1333_v31 = vmul.f32 1.442695, %v1320_v43 }
 0x3ab   :  { %v1296_v51 = vpop.xlane.xlu1 %1295 }
 0x3ac   :  { %v1316_v53 = vsub.f32 %v1284_v28, %v1296_v51 }
 0x3ad   :  { %v1305_v54 = vpop.xlane.xlu0 %1304 }
 0x3ae   :  { %v1325_v57 = vmul.f32 1.442695, %v1316_v53  ;;  %v1319_v58 = vsub.f32 %v1287_v29, %v1305_v54 }
 0x3b0   :  { %2095 = vpow2.f32 %v1325_v57  ;;  %v1331_v47 = vmul.f32 1.442695, %v1319_v58 }
 0x3b2   :  { %2097 = vpow2.f32 %v1331_v47 }
 0x3b3   :  { %v1314_v42 = vpop.xlane.xlu2 %1313  ;;  %2099 = vpow2.f32 %v1335_v60 }
 0x3b4   :  { %v1322_v0 = vsub.f32 %v1290_v38, %v1314_v42  ;;  %2101 = vpow2.f32 %v1333_v31 }
 0x3b6   :  { %v2676_v2 = vpop.eup %2095  ;;  %v1337_v7 = vmul.f32 1.442695, %v1322_v0 }
 0x3b7   :  { %v1342_v8 = vsel %vm906_vm9, %v2676_v2, 0.0 }
 0x3b8   :  { %v2680_v1 = vpop.eup %2097  ;;  %2103 = vpow2.f32 %v1337_v7  ;;  %1343 = vadd.xlane.f32.xlu0 %v1342_v8 }
 0x3b9   :  { %v1351_v9 = vsel %vm906_vm9, %v2680_v1, 0.0  ;;  %v2684_v12 = vpop.eup %2099 }
 0x3ba   :  { %1352 = vadd.xlane.f32.xlu1 %v1351_v9  ;;  %v2686_v11 = vpop.eup %2101  ;;  %v1357_v20 = vsel %vm906_vm9, %v2684_v12, 0.0 }
 0x3bb   :  { %v2076_v56 = vpop.permute.xlu2 %2075  ;;  %v1354_v26 = vsel %vm906_vm9, %v2686_v11, 0.0 }
 0x3bc   :  { %v2078_v13 = vunpack.i.h.bf16 %v2076_v56  ;;  %v2077_v52 = vunpack.i.l.bf16 %v2076_v56 }
 0x3be   :  { %v2688_v14 = vpop.eup %2103  ;;  %v746_v28 = vrot.slane %v2078_v13, 4  ;;  %v734_v29 = vrot.slane %v2077_v52, 4 }
 0x3bf   :  { %v1360_v19 = vsel %vm906_vm9, %v2688_v14, 0.0 }
 0x3c0   :  { %1361 = vadd.xlane.f32.xlu2 %v1360_v19  ;;  %1358 = vadd.xlane.f32.xlu0 %v1357_v20  ;;  %v2071_v21 = vpop.permute.xlu0 %2070 }
 0x3c1   :  { %v2073_v33 = vunpack.i.h.bf16 %v2071_v21  ;;  %v2072_v34 = vunpack.i.l.bf16 %v2071_v21 }
 0x3c2   :  { %1355 = vadd.xlane.f32.xlu1 %v1354_v26 }
 0x3c3   :  { %v747_v35 = vsel %vm190_vm8, %v746_v28, %v2073_v33  ;;  %v748_v18 = vrot.slane %v2073_v33, 4  ;;  %v735_v59 = vsel %vm190_vm8, %v734_v29, %v2072_v34  ;;  %v736_v32 = vrot.slane %v2072_v34, 4  ;;  %v2066_v24 = vpop.permute.xlu1 %2065 }
 0x3c4   :  { %v753_v36 = vperm.slane %v747_v35, %v2342_v5  ;;  %v741_v38 = vperm.slane %v735_v59, %v2342_v5  ;;  %v2068_v39 = vunpack.i.h.bf16 %v2066_v24  ;;  %v2067_v30 = vunpack.i.l.bf16 %v2066_v24 }
 0x3c5   :  { %v749_v6 = vsel %vm190_vm8, %v2078_v13, %v748_v18  ;;  %v737_v37 = vsel %vm190_vm8, %v2077_v52, %v736_v32 }
 0x3c6   :  { %v757_v40 = vperm.slane %v749_v6, %v2342_v5  ;;  %v758_v61 = vrot.slane %v753_v36, 4  ;;  %v745_v41 = vperm.slane %v737_v37, %v2342_v5  ;;  %v760_v25 = vrot.slane %v741_v38, 4 }
 0x3c7   :  { %v690_v46 = vrot.slane %v2068_v39, 4  ;;  %v693_v63 = vsel %vm190_vm8, %v2068_v39, %v692_v45  ;;  %v678_v48 = vrot.slane %v2067_v30, 4  ;;  %v681_v3 = vsel %vm190_vm8, %v2067_v30, %v680_v44 }
 0x3c8   :  { %v770_v15 = vrot.slane %v757_v40, 4  ;;  %v759_v27 = vsel %vm190_vm8, %v758_v61, %v741_v38  ;;  %v761_v50 = vsel %vm190_vm8, %v753_v36, %v760_v25  ;;  %v772_v49 = vrot.slane %v745_v41, 4 }
 0x3c9   :  { %v765_v51 = vperm.slane %v759_v27, %v2356_v17  ;;  %v769_v53 = vperm.slane %v761_v50, %v2356_v17  ;;  %v691_v54 = vsel %vm190_vm8, %v690_v46, %v2063_v62  ;;  %v701_v55 = vperm.slane %v693_v63, %v2342_v5 }
 0x3ca   :  { %v771_v57 = vsel %vm190_vm8, %v770_v15, %v745_v41  ;;  %v773_v58 = vsel %vm190_vm8, %v757_v40, %v772_v49  ;;  %v697_v43 = vperm.slane %v691_v54, %v2342_v5  ;;  %v679_v47 = vsel %vm190_vm8, %v678_v48, %v2062_v4 }
 0x3cb   :  { %v777_v60 = vperm.slane %v771_v57, %v2356_v17  ;;  %v781_v31 = vperm.slane %v773_v58, %v2356_v17  ;;  %v782_v42 = vrot.slane %v765_v51, 4  ;;  %v784_v0 = vrot.slane %v769_v53, 4 }
 0x3cc   :  { %v702_v7 = vrot.slane %v697_v43, 4  ;;  %v714_v8 = vrot.slane %v701_v55, 4  ;;  %v685_v9 = vperm.slane %v679_v47, %v2342_v5  ;;  %v689_v56 = vperm.slane %v681_v3, %v2342_v5 }
 0x3cd   :  { %v785_v13 = vsel %vm190_vm8, 0.0, %v784_v0  ;;  %v786_v52 = vrot.slane %v777_v60, 4  ;;  %v788_v19 = vrot.slane %v781_v31, 4  ;;  %v783_v20 = vsel %vm190_vm8, 0.0, %v782_v42 }
 0x3ce   :  { %v849_v62 = vrot.slane %v785_v13, 4  ;;  %v703_v4 = vsel %vm190_vm8, %v702_v7, %v685_v9  ;;  %v704_v21 = vrot.slane %v685_v9, 4  ;;  %v715_v26 = vsel %vm190_vm8, %v714_v8, %v689_v56 }
 0x3cf   :  { %v789_v28 = vsel %vm190_vm8, 0.0, %v788_v19  ;;  %v709_v29 = vperm.slane %v703_v4, %v2356_v17  ;;  %v716_v33 = vrot.slane %v689_v56, 4  ;;  %v721_v34 = vperm.slane %v715_v26, %v2356_v17 }
 0x3d0   :  { %v860_v35 = vrot.slane %v789_v28, 4  ;;  %v705_v18 = vsel %vm190_vm8, %v697_v43, %v704_v21  ;;  %v787_v59 = vsel %vm190_vm8, 0.0, %v786_v52  ;;  %v844_v32 = vsel %vm190_vm8, %v784_v0, %v765_v51 }
 0x3d1   :  { %v713_v24 = vperm.slane %v705_v18, %v2356_v17  ;;  %v717_v36 = vsel %vm190_vm8, %v701_v55, %v716_v33  ;;  %v726_v38 = vrot.slane %v709_v29, 4  ;;  %v730_v39 = vrot.slane %v721_v34, 4 }
 0x3d2   :  { %v725_v30 = vperm.slane %v717_v36, %v2356_v17  ;;  %v848_v45 = vperm.slane %v844_v32, %v2342_v5  ;;  %v850_v44 = vsel %vm190_vm8, %v849_v62, %v783_v20  ;;  %v855_v6 = vsel %vm190_vm8, %v788_v19, %v777_v60 }
 0x3d3   :  { %v728_v37 = vrot.slane %v713_v24, 4  ;;  %v731_v40 = vsel %vm190_vm8, 0.0, %v730_v39  ;;  %v727_v61 = vsel %vm190_vm8, 0.0, %v726_v38  ;;  %v854_v41 = vperm.slane %v850_v44, %v2342_v5 }
 0x3d4   :  { %v732_v25 = vrot.slane %v725_v30, 4  ;;  %v859_v46 = vperm.slane %v855_v6, %v2342_v5  ;;  %v861_v63 = vsel %vm190_vm8, %v860_v35, %v787_v59  ;;  %v868_v48 = vrot.slane %v848_v45, 4 }
 0x3d5   :  { %v729_v3 = vsel %vm190_vm8, 0.0, %v728_v37  ;;  %v790_v15 = vsel %vm190_vm8, %v728_v37, %v709_v29  ;;  %v865_v27 = vperm.slane %v861_v63, %v2342_v5  ;;  %v866_v50 = vrot.slane %v854_v41, 4 }
 0x3d6   :  { %v733_v49 = vsel %vm190_vm8, 0.0, %v732_v25  ;;  %v795_v51 = vrot.slane %v729_v3, 4  ;;  %v801_v53 = vsel %vm190_vm8, %v732_v25, %v721_v34  ;;  %v794_v54 = vperm.slane %v790_v15, %v2342_v5 }
 0x3d7   :  { %v806_v55 = vrot.slane %v733_v49, 4  ;;  %v805_v57 = vperm.slane %v801_v53, %v2342_v5  ;;  %v869_v58 = vsel %vm190_vm8, %v854_v41, %v868_v48  ;;  %v880_v43 = vrot.slane %v859_v46, 4 }
 0x3d8   :  { %v796_v47 = vsel %vm190_vm8, %v795_v51, %v727_v61  ;;  %v814_v60 = vrot.slane %v794_v54, 4  ;;  %v877_v31 = vperm.slane %v869_v58, %v2356_v17  ;;  %v867_v42 = vsel %vm190_vm8, %v866_v50, %v848_v45 }
 0x3d9   :  { %v800_v0 = vperm.slane %v796_v47, %v2342_v5  ;;  %v807_v7 = vsel %vm190_vm8, %v806_v55, %v731_v40  ;;  %v826_v8 = vrot.slane %v805_v57, 4  ;;  %v881_v9 = vsel %vm190_vm8, %v865_v27, %v880_v43 }
 0x3da   :  { %v811_v56 = vperm.slane %v807_v7, %v2342_v5  ;;  %v889_v13 = vperm.slane %v881_v9, %v2356_v17  ;;  %v878_v52 = vrot.slane %v865_v27, 4  ;;  %v873_v62 = vperm.slane %v867_v42, %v2356_v17 }
 0x3db   :  { %v815_v19 = vsel %vm190_vm8, %v800_v0, %v814_v60  ;;  %v812_v20 = vrot.slane %v800_v0, 4  ;;  %v896_v35 = vrot.slane %v877_v31, 4 }
 0x3dc   :  { %v823_v4 = vperm.slane %v815_v19, %v2356_v17  ;;  %v827_v21 = vsel %vm190_vm8, %v811_v56, %v826_v8  ;;  %v894_v26 = vrot.slane %v889_v13, 4  ;;  %v824_v28 = vrot.slane %v811_v56, 4 }
 0x3dd   :  { %v835_v29 = vperm.slane %v827_v21, %v2356_v17  ;;  %v813_v33 = vsel %vm190_vm8, %v812_v20, %v794_v54  ;;  %v879_v34 = vsel %vm190_vm8, %v878_v52, %v859_v46  ;;  %v892_v39 = vrot.slane %v873_v62, 4 }
 0x3de   :  { %v819_v18 = vperm.slane %v813_v33, %v2356_v17  ;;  %v825_v59 = vsel %vm190_vm8, %v824_v28, %v805_v57  ;;  %v842_v32 = vrot.slane %v823_v4, 4  ;;  %v885_v38 = vperm.slane %v879_v34, %v2356_v17 }
 0x3df   :  { %v840_v24 = vrot.slane %v835_v29, 4  ;;  %v831_v36 = vperm.slane %v825_v59, %v2356_v17  ;;  %v895_v30 = vsel %vm190_vm8, %v894_v26, %v877_v31  ;;  %v897_v61 = vsel %vm190_vm8, %v889_v13, %v896_v35 }
 0x3e0   :  { %v843_v45 = vsel %vm190_vm8, %v835_v29, %v842_v32  ;;  %v838_v44 = vrot.slane %v819_v18, 4  ;;  %v890_v40 = vrot.slane %v885_v38, 4  ;;  %v893_v63 = vsel %vm190_vm8, %v885_v38, %v892_v39 }
 0x3e1   :  { %v841_v6 = vsel %vm190_vm8, %v840_v24, %v823_v4  ;;  %v836_v37 = vrot.slane %v831_v36, 4  ;;  %1466 = vmatpush.msra.mxu2 %v843_v45 }
 0x3e2   :  { %1443 = vmatpush.msra.mxu1 %v841_v6  ;;  %v839_v41 = vsel %vm190_vm8, %v831_v36, %v838_v44  ;;  %v891_v46 = vsel %vm190_vm8, %v890_v40, %v873_v62 }
 0x3e3   :  { %1558 = vmatpush.msrb.mxu2 %v897_v61  ;;  %v837_v25 = vsel %vm190_vm8, %v836_v37, %v819_v18  ;;  %1420 = vmatpush.msrb.mxu0 %v839_v41 }
 0x3e4   :  { %1535 = vmatpush.msrb.mxu1 %v895_v30  ;;  %1397 = vmatpush.msra.mxu3 %v837_v25 }
 0x3e5   :  { %1512 = vmatpush.msra.mxu0 %v893_v63 }
 0x3e6   :  { %1489 = vmatpush.msrb.mxu3 %v891_v46 }
 0x412   :  { %v1350_v48 = vpop.xlane.xlu1 %1349 }
 0x413   :  { %2105 = vrcp.f32 %v1350_v48 }
 0x419   :  { %v2106_v3 = vpop.eup %2105  ;;  %v1347_v15 = vpop.xlane.xlu2 %1346 }
 0x41a   :  { %v1374_v27 = vmul.f32 %v2106_v3, %v2662_v16  ;;  %2107 = vrcp.f32 %v1347_v15 }
 0x41b   :  { %v1341_v50 = vpop.xlane.xlu0 %1340 }
 0x41c   :  { %2109 = vrcp.f32 %v1341_v50  ;;  %2032 = vmatmul.msk.f32.vlgmr.msra.gmra.mxu2 %vm906_vm9, %v1374_v27 }
 0x420   :  { %v2108_v49 = vpop.eup %2107 }
 0x421   :  { %v1373_v51 = vmul.f32 %v2108_v49, %v2666_v22 }
 0x422   :  { %v2110_v53 = vpop.eup %2109 }
 0x423   :  { %v1371_v54 = vmul.f32 %v2110_v53, %v2670_v23  ;;  %2031 = vmatmul.msk.f32.vlgmr.msra.gmra.mxu1 %vm906_vm9, %v1373_v51 }
 0x425   :  { %2029 = vmatmul.msk.f32.vlgmr.msra.gmra.mxu3 %vm906_vm9, %v1371_v54 }
 0x42b   :  { %v1344_v55 = vpop.xlane.xlu0 %1343 }
 0x42c   :  { %2111 = vrcp.f32 %v1344_v55 }
 0x42d   :  { %v1353_v57 = vpop.xlane.xlu1 %1352 }
 0x42e   :  { %2113 = vrcp.f32 %v1353_v57 }
 0x432   :  { %v2112_v16 = vpop.eup %2111 }
 0x433   :  { %v1362_v58 = vpop.xlane.xlu2 %1361  ;;  %v1359_v43 = vpop.xlane.xlu0 %1358  ;;  %v1372_v47 = vmul.f32 %v2112_v16, %v2676_v2 }
 0x434   :  { %v2114_v60 = vpop.eup %2113  ;;  %2115 = vrcp.f32 %v1362_v58 }
 0x435   :  { %v1375_v22 = vmul.f32 %v2114_v60, %v2680_v1  ;;  %2117 = vrcp.f32 %v1359_v43  ;;  %2030 = vmatmul.msk.f32.vlgmr.msrb.gmra.mxu0 %vm906_vm9, %v1372_v47  ;;  %v1356_v23 = vpop.xlane.xlu1 %1355 }
 0x436   :  { %2119 = vrcp.f32 %v1356_v23 }
 0x437   :  { %2033 = vmatmul.msk.f32.vlgmr.msrb.gmra.mxu3 %vm906_vm9, %v1375_v22 }
 0x43a   :  { %v2116_v31 = vpop.eup %2115 }
 0x43b   :  { %v2118_v42 = vpop.eup %2117  ;;  %v1378_v0 = vmul.f32 %v2116_v31, %v2688_v14 }
 0x43c   :  { %v2120_v7 = vpop.eup %2119  ;;  %v1377_v8 = vmul.f32 %v2118_v42, %v2684_v12 }
 0x43d   :  { %v1376_v2 = vmul.f32 %v2120_v7, %v2686_v11  ;;  %2036 = vmatmul.msk.f32.vlgmr.msrb.gmra.mxu2 %vm906_vm9, %v1378_v0 }
 0x43e   :  { %2035 = vmatmul.msk.f32.vlgmr.msrb.gmra.mxu1 %vm906_vm9, %v1377_v8 }
 0x43f   :  { %2034 = vmatmul.msk.f32.vlgmr.msra.gmra.mxu0 %vm906_vm9, %v1376_v2 }
 0x49f   :  { %v1468_v19 = vpop.f32.mrf.mxu2 }
 0x4a0   :  { %v1445_v1 = vpop.f32.mrf.mxu1  ;;  %v1575_v12 = vrot.slane %v1468_v19, 4 }
 0x4a1   :  { %v1563_v56 = vrot.slane %v1445_v1, 4 }
 0x4a8   :  { %v1399_v9 = vpop.f32.mrf.mxu3 }
 0x4a9   :  { %v1565_v13 = vrot.slane %v1399_v9, 4  ;;  %v1564_v52 = vsel %vm190_vm8, %v1563_v56, %v1399_v9 }
 0x4aa   :  { %v1570_v20 = vperm.slane %v1564_v52, %v2342_v5 }
 0x4ab   :  { %v1566_v14 = vsel %vm190_vm8, %v1445_v1, %v1565_v13 }
 0x4ac   :  { %v1574_v11 = vperm.slane %v1566_v14, %v2342_v5  ;;  %v1589_v26 = vrot.slane %v1570_v20, 4 }
 0x4ae   :  { %v1601_v33 = vrot.slane %v1574_v11, 4 }
 0x4b2   :  { %v1422_v62 = vpop.f32.mrf.mxu0 }
 0x4b3   :  { %v1576_v4 = vsel %vm190_vm8, %v1575_v12, %v1422_v62  ;;  %v1577_v21 = vrot.slane %v1422_v62, 4 }
 0x4b4   :  { %v1582_v28 = vperm.slane %v1576_v4, %v2342_v5 }
 0x4b5   :  { %v1578_v29 = vsel %vm190_vm8, %v1468_v19, %v1577_v21 }
 0x4b6   :  { %v1586_v34 = vperm.slane %v1578_v29, %v2342_v5  ;;  %v1587_v35 = vrot.slane %v1582_v28, 4  ;;  %v1590_v18 = vsel %vm190_vm8, %v1582_v28, %v1589_v26 }
 0x4b7   :  { %v1598_v59 = vperm.slane %v1590_v18, %v2356_v17 }
 0x4b8   :  { %v1588_v32 = vsel %vm190_vm8, %v1587_v35, %v1570_v20  ;;  %v1599_v24 = vrot.slane %v1586_v34, 4  ;;  %v1602_v36 = vsel %vm190_vm8, %v1586_v34, %v1601_v33 }
 0x4b9   :  { %v1594_v38 = vperm.slane %v1588_v32, %v2356_v17  ;;  %v1610_v39 = vperm.slane %v1602_v36, %v2356_v17  ;;  %v1613_v30 = vrot.slane %v1598_v59, 4 }
 0x4ba   :  { %v1600_v45 = vsel %vm190_vm8, %v1599_v24, %v1574_v11  ;;  %v1491_v44 = vpop.f32.mrf.mxu3 }
 0x4bb   :  { %v1606_v6 = vperm.slane %v1600_v45, %v2356_v17  ;;  %v1611_v37 = vrot.slane %v1594_v38, 4  ;;  %v1614_v40 = vsel %vm190_vm8, 0.0, %v1613_v30  ;;  %v1617_v61 = vrot.slane %v1610_v39, 4  ;;  %v1537_v41 = vpop.f32.mrf.mxu1 }
 0x4bc   :  { %v1675_v25 = vsel %vm190_vm8, %v1613_v30, %v1594_v38  ;;  %v1680_v46 = vrot.slane %v1614_v40, 4  ;;  %v1619_v63 = vrot.slane %v1537_v41, 4  ;;  %v1621_v48 = vrot.slane %v1491_v44, 4  ;;  %v1514_v3 = vpop.f32.mrf.mxu0 }
 0x4bd   :  { %v1612_v15 = vsel %vm190_vm8, 0.0, %v1611_v37  ;;  %v1615_v27 = vrot.slane %v1606_v6, 4  ;;  %v1618_v50 = vsel %vm190_vm8, 0.0, %v1617_v61  ;;  %v1679_v49 = vperm.slane %v1675_v25, %v2342_v5 }
 0x4be   :  { %v1691_v51 = vrot.slane %v1618_v50, 4  ;;  %v1620_v53 = vsel %vm190_vm8, %v1619_v63, %v1491_v44  ;;  %v1622_v54 = vsel %vm190_vm8, %v1537_v41, %v1621_v48  ;;  %v1633_v55 = vrot.slane %v1514_v3, 4 }
 0x4bf   :  { %v1626_v57 = vperm.slane %v1620_v53, %v2342_v5  ;;  %v1630_v16 = vperm.slane %v1622_v54, %v2342_v5  ;;  %v1616_v58 = vsel %vm190_vm8, 0.0, %v1615_v27  ;;  %v1681_v43 = vsel %vm190_vm8, %v1680_v46, %v1612_v15 }
 0x4c0   :  { %v1560_v47 = vpop.f32.mrf.mxu2  ;;  %v1685_v60 = vperm.slane %v1681_v43, %v2342_v5  ;;  %v1686_v22 = vsel %vm190_vm8, %v1617_v61, %v1606_v6  ;;  %v1692_v23 = vsel %vm190_vm8, %v1691_v51, %v1616_v58  ;;  %v1699_v31 = vrot.slane %v1679_v49, 4 }
 0x4c1   :  { %v1657_v42 = vrot.slane %v1630_v16, 4  ;;  %v1631_v0 = vrot.slane %v1560_v47, 4  ;;  %v1634_v7 = vsel %vm190_vm8, %v1560_v47, %v1633_v55  ;;  %v1690_v2 = vperm.slane %v1686_v22, %v2342_v5 }
 0x4c2   :  { %v1642_v8 = vperm.slane %v1634_v7, %v2342_v5  ;;  %v1696_v1 = vperm.slane %v1692_v23, %v2342_v5  ;;  %v1700_v9 = vsel %vm190_vm8, %v1685_v60, %v1699_v31  ;;  %v1645_v56 = vrot.slane %v1626_v57, 4 }
 0x4c3   :  { %v1632_v13 = vsel %vm190_vm8, %v1631_v0, %v1514_v3  ;;  %v1708_v52 = vperm.slane %v1700_v9, %v2356_v17  ;;  %v1697_v19 = vrot.slane %v1685_v60, 4  ;;  %v1711_v11 = vrot.slane %v1690_v2, 4 }
 0x4c4   :  { %v1638_v14 = vperm.slane %v1632_v13, %v2342_v5  ;;  %v1655_v20 = vrot.slane %v1642_v8, 4  ;;  %v1658_v12 = vsel %vm190_vm8, %v1642_v8, %v1657_v42  ;;  %v1709_v26 = vrot.slane %v1696_v1, 4 }
 0x4c5   :  { %v1666_v62 = vperm.slane %v1658_v12, %v2356_v17  ;;  %v1727_v4 = vrot.slane %v1708_v52, 4  ;;  %v1698_v21 = vsel %vm190_vm8, %v1697_v19, %v1679_v49  ;;  %v1712_v34 = vsel %vm190_vm8, %v1696_v1, %v1711_v11  ;;  %v1817_v11 = vld [vmem:[%s2971_s4 + $0x10] sm:$0xff] }
 0x4c6   :  { %v1643_v28 = vrot.slane %v1638_v14, 4  ;;  %v1646_v29 = vsel %vm190_vm8, %v1638_v14, %v1645_v56  ;;  %v1656_v33 = vsel %vm190_vm8, %v1655_v20, %v1630_v16  ;;  %v1720_v32 = vperm.slane %v1712_v34, %v2356_v17 }
 0x4c7   :  { %v1654_v35 = vperm.slane %v1646_v29, %v2356_v17  ;;  %v1662_v18 = vperm.slane %v1656_v33, %v2356_v17  ;;  %v1673_v59 = vrot.slane %v1666_v62, 4  ;;  %v1704_v36 = vperm.slane %v1698_v21, %v2356_v17  ;;  %v1816_v62 = vld [vmem:[%s2971_s4 + $0x8] sm:$0xff] }
 0x4c8   :  { %v1644_v24 = vsel %vm190_vm8, %v1643_v28, %v1626_v57  ;;  %v1710_v38 = vsel %vm190_vm8, %v1709_v26, %v1690_v2  ;;  %v1728_v40 = vsel %vm190_vm8, %v1720_v32, %v1727_v4  ;;  %v1725_v61 = vrot.slane %v1720_v32, 4  ;;  %v1815_v4 = vld [vmem:[%s2971_s4] sm:$0xff] }
 0x4c9   :  { %v1650_v39 = vperm.slane %v1644_v24, %v2356_v17  ;;  %v1669_v30 = vrot.slane %v1654_v35, 4  ;;  %v1671_v45 = vrot.slane %v1662_v18, 4  ;;  %v1674_v44 = vsel %vm190_vm8, 0.0, %v1673_v59  ;;  %1801 = vrot.lane.b32.xlu1 %v1728_v40, %s2220_s17 }
 0x4ca   :  { %v1740_v6 = vsel %vm190_vm8, %v1673_v59, %v1662_v18  ;;  %v1745_v37 = vrot.slane %v1674_v44, 4  ;;  %v1726_v3 = vsel %vm190_vm8, %v1725_v61, %v1708_v52  ;;  %v1716_v15 = vperm.slane %v1710_v38, %v2356_v17  ;;  %v2080_v38 = vld [vmem:[%s2972_s5] ss:$0 sm:$0xff]  ;;  %v2126_v61 = vld [vmem:[#allocation2 + $0x8] sm:$0xff] }
 0x4cb   :  { %v1667_v41 = vrot.slane %v1650_v39, 4  ;;  %v1670_v25 = vsel %vm190_vm8, 0.0, %v1669_v30  ;;  %v1672_v46 = vsel %vm190_vm8, 0.0, %v1671_v45  ;;  %v1744_v63 = vperm.slane %v1740_v6, %v2342_v5  ;;  %1793 = vrot.lane.b32.xlu0 %v1726_v3, %s2221_s18  ;;  %v2125_v45 = vld [vmem:[#allocation2] sm:$0xff] }
 0x4cc   :  { %v1734_v48 = vrot.slane %v1670_v25, 4  ;;  %v1723_v27 = vrot.slane %v1704_v36, 4  ;;  %v1729_v49 = vsel %vm190_vm8, %v1669_v30, %v1650_v39  ;;  %v1746_v51 = vsel %vm190_vm8, %v1745_v37, %v1672_v46 }
 0x4cd   :  { %v1668_v50 = vsel %vm190_vm8, 0.0, %v1667_v41  ;;  %v1765_v53 = vrot.slane %v1744_v63, 4  ;;  %v1721_v54 = vrot.slane %v1716_v15, 4  ;;  %v1733_v57 = vperm.slane %v1729_v49, %v2342_v5 }
 0x4ce   :  { %v1724_v55 = vsel %vm190_vm8, %v1716_v15, %v1723_v27  ;;  %v1735_v16 = vsel %vm190_vm8, %v1734_v48, %v1668_v50  ;;  %v1750_v43 = vperm.slane %v1746_v51, %v2342_v5 }
 0x4cf   :  { %1785 = vrot.lane.b32.xlu2 %v1724_v55, %s2209_s22  ;;  %v1739_v58 = vperm.slane %v1735_v16, %v2342_v5  ;;  %v1753_v47 = vrot.slane %v1733_v57, 4  ;;  %v1722_v60 = vsel %vm190_vm8, %v1721_v54, %v1704_v36  ;;  %v1909_v16 = vld [vmem:[%s2973_s6 + $0x18] sm:$0xff] }
 0x4d0   :  { %v1766_v22 = vsel %vm190_vm8, %v1750_v43, %v1765_v53  ;;  %v1763_v31 = vrot.slane %v1750_v43, 4  ;;  %1932 = vmatpush.msrb.mxu0 %v1909_v16  ;;  %v1907_v43 = vld [vmem:[%s2973_s6 + $0x8] sm:$0xff] }
 0x4d1   :  { %v1751_v23 = vrot.slane %v1739_v58, 4  ;;  %v1754_v42 = vsel %vm190_vm8, %v1739_v58, %v1753_v47  ;;  %v1774_v0 = vperm.slane %v1766_v22, %v2356_v17  ;;  %v1908_v58 = vld [vmem:[%s2973_s6 + $0x10] sm:$0xff]  ;;  %v1906_v47 = vld [vmem:[%s2973_s6] sm:$0xff] }
 0x4d2   :  { %v1762_v7 = vperm.slane %v1754_v42, %v2356_v17  ;;  %v1764_v2 = vsel %vm190_vm8, %v1763_v31, %v1744_v63  ;;  %1933 = vmatpush.msrb.mxu0 %v1908_v58  ;;  %v1951_v22 = vld [vmem:[%s2975_s8 + $0x30] sm:$0xff]  ;;  %v1950_v42 = vld [vmem:[%s2975_s8 + $0x28] sm:$0xff] }
 0x4d3   :  { %v1752_v8 = vsel %vm190_vm8, %v1751_v23, %v1733_v57  ;;  %v1779_v1 = vrot.slane %v1774_v0, 4  ;;  %v1770_v9 = vperm.slane %v1764_v2, %v2356_v17  ;;  %v1949_v2 = vld [vmem:[%s2975_s8 + $0x20] sm:$0xff] }
 0x4d4   :  { %v1758_v5 = vperm.slane %v1752_v8, %v2356_v17  ;;  %v1781_v56 = vrot.slane %v1762_v7, 4  ;;  %v1818_v17 = vld [vmem:[%s2971_s4 + $0x18] sm:$0xff]  ;;  %1934 = vmatpush.msrb.mxu0 %v1907_v43 }
 0x4d5   :  { %v1780_v13 = vsel %vm190_vm8, %v1779_v1, %v1762_v7  ;;  %v1775_v52 = vrot.slane %v1770_v9, 4  ;;  %1841 = vmatpush.msra.mxu3 %v1818_v17 }
 0x4d6   :  { %v1777_v19 = vrot.slane %v1758_v5, 4  ;;  %v1782_v14 = vsel %vm190_vm8, %v1774_v0, %v1781_v56  ;;  %1935 = vmatpush.msrb.mxu0 %v1906_v47 }
 0x4d7   :  { %1795 = vrot.lane.b32.xlu2 %v1780_v13, %s2221_s18  ;;  %1803 = vrot.lane.b32.xlu1 %v1782_v14, %s2220_s17  ;;  %v1776_v12 = vsel %vm190_vm8, %v1775_v52, %v1758_v5  ;;  %v2127_v52 = vld [vmem:[#allocation5] sm:$0xf] }
 0x4d8   :  { %v1778_v20 = vsel %vm190_vm8, %v1770_v9, %v1777_v19  ;;  %1842 = vmatpush.msra.mxu3 %v1817_v11  ;;  %v1948_v9 = vld [vmem:[%s2975_s8 + $0x18] sm:$0xff] }
 0x4d9   :  { %1787 = vrot.lane.b32.xlu0 %v1778_v20, %s2209_s22  ;;  %v1902_v20 = vperm.slane %v2127_v52, 3 }
 0x4da   :  { %1843 = vmatpush.msra.mxu3 %v1816_v62 }
 0x4dc   :  { %1844 = vmatpush.msra.mxu3 %v1815_v4 }
 0x529   :  { %v1786_v21 = vpop.permute.xlu2 %1785 }
 0x52a   :  { %v1807_v26 = vsel %vm906_vm9, %v1722_v60, %v1786_v21  ;;  %v1952_v60 = vld [vmem:[%s2975_s8 + $0x38] sm:$0xff] }
 0x52b   :  { %1972 = vmatpush.msra.mxu1 %v1952_v60 }
 0x52d   :  { %1973 = vmatpush.msra.mxu1 %v1951_v22 }
 0x52f   :  { %1974 = vmatpush.msra.mxu1 %v1950_v42 }
 0x531   :  { %v1796_v18 = vpop.permute.xlu2 %1795  ;;  %1975 = vmatpush.msra.mxu1 %v1949_v2 }
 0x533   :  { %1976 = vmatpush.msra.mxu1 %v1948_v9 }
 0x53b   :  { %v1802_v29 = vpop.permute.xlu1 %1801 }
 0x53d   :  { %v1794_v28 = vpop.permute.xlu0 %1793 }
 0x53e   :  { %v1810_v33 = vsel %vm1809_vm10, %v1807_v26, %v1794_v28 }
 0x53f   :  { %v1813_v34 = vsel %vm1812_vm11, %v1810_v33, %v1802_v29  ;;  %v2128_v29 = vld [vmem:[#allocation5 + $0x4] sm:$0xf] }
 0x540   :  { %2037 = vmatmul.msk.f32.vlgmr.msra.gmra.mxu3 %vm72_vm0, %v1813_v34  ;;  %v1899_v33 = vperm.slane %v2128_v29, 2 }
 0x549   :  { %v1804_v32 = vpop.permute.xlu1 %1803 }
 0x54b   :  { %v1788_v35 = vpop.permute.xlu0 %1787 }
 0x54c   :  { %v1808_v59 = vsel %vm906_vm9, %v1776_v12, %v1788_v35 }
 0x54d   :  { %v1811_v24 = vsel %vm1809_vm10, %v1808_v59, %v1796_v18  ;;  %v1903_v18 = vperm.slane %v2128_v29, 3 }
 0x54e   :  { %v1814_v36 = vsel %vm1812_vm11, %v1811_v24, %v1804_v32  ;;  %v1947_v24 = vld [vmem:[%s2975_s8 + $0x10] sm:$0xff] }
 0x54f   :  { %2038 = vmatmul.msk.f32.gmra.mxu3 %vm72_vm0, %v1814_v36  ;;  %v1946_v36 = vld [vmem:[%s2975_s8 + $0x8] sm:$0xff]  ;;  %1977 = vmatpush.msra.mxu1 %v1947_v24 }
 0x551   :  { %1978 = vmatpush.msra.mxu1 %v1946_v36 }
 0x5c3   :  { %v1846_v39 = vpop.f32.mrf.mxu3 }
 0x5c4   :  { %v1847_v30 = vadd.f32 %v2080_v38, %v1846_v39  ;;  %v2081_v39 = vld [vmem:[%s2974_s7] ss:$0 sm:$0xff]  ;;  %s2222_s7 = smov [#allocation7]  }
 0x5c6   :  { %v2897_v44 = vadd.f32 %v2125_v45, %v1847_v30 }
 0x5c8   :  { %v1854_v6 = vsel %vm72_vm0, %v2897_v44, 0.0 }
 0x5c9   :  { %1855 = vadd.xlane.f32.xlu0 %v1854_v6 }
 0x5d2   :  { %v1849_v37 = vpop.f32.mrf.mxu3 }
 0x5d3   :  { %v1850_v40 = vadd.f32 %v2080_v38, %v1849_v37  ;;  %v1945_v38 = vld [vmem:[%s2975_s8] sm:$0xff]  ;;  %s1995_s8 = sshll.u32 %s2222_s7, 4  ;;  %s1996_s8 = int_to_ptr.vmem [resolvable:$true] %s1995_s8 }
 0x5d4   :  { %1979 = vmatpush.msra.mxu1 %v1945_v38 }
 0x5d5   :  { %v2901_v41 = vadd.f32 %v2126_v61, %v1850_v40 }
 0x5d7   :  { %v1857_v25 = vsel %vm72_vm0, %v2901_v41, 0.0 }
 0x5d8   :  { %1858 = vadd.xlane.f32.xlu2 %v1857_v25  ;;  %v2082_v25 = vld [vmem:[%s2976_s9] ss:$0 sm:$0xff] }
 0x63c   :  { %v1856_v46 = vpop.xlane.xlu0 %1855 }
 0x63d   :  { %v1860_v63 = vmul.f32 %v1856_v46, %v2291_v10 }
 0x63f   :  { %v1862_v48 = vsub.f32 %v2897_v44, %v1860_v63 }
 0x641   :  { %v1864_v3 = vmul.f32 %v1862_v48, %v1862_v48 }
 0x643   :  { %v1866_v15 = vsel %vm72_vm0, %v1864_v3, 0.0 }
 0x644   :  { %1867 = vadd.xlane.f32.xlu1 %v1866_v15 }
 0x64b   :  { %v1859_v27 = vpop.xlane.xlu2 %1858 }
 0x64c   :  { %v1861_v50 = vmul.f32 %v1859_v27, %v2291_v10 }
 0x64e   :  { %v1863_v49 = vsub.f32 %v2901_v41, %v1861_v50 }
 0x650   :  { %v1865_v51 = vmul.f32 %v1863_v49, %v1863_v49 }
 0x652   :  { %v1869_v53 = vsel %vm72_vm0, %v1865_v51, 0.0 }
 0x653   :  { %1870 = vadd.xlane.f32.xlu0 %v1869_v53 }
 0x6b7   :  { %v1868_v54 = vpop.xlane.xlu1 %1867 }
 0x6b8   :  { %v1872_v55 = vmul.f32 %v1868_v54, %v2291_v10 }
 0x6ba   :  { %v1874_v57 = vadd.f32 1e-05, %v1872_v55 }
 0x6bc   :  { %2121 = vrsqrt.f32 %v1874_v57  ;;  %vm1882_vm13 = vweird.f32 %v1874_v57 }
 0x6c2   :  { %v2122_v23 = vpop.eup %2121 }
 0x6c3   :  { %v1877_v31 = vmul.f32 %v2122_v23, %v1874_v57  ;;  %vm1883_vm12 = vweird.f32 %v2122_v23 }
 0x6c4   :  { %vm1884_vm14 = vmor %vm1882_vm13, %vm1883_vm12 }
 0x6c5   :  { %v1878_v7 = vmul.f32 %v2122_v23, %v1877_v31 }
 0x6c6   :  { %v1871_v0 = vpop.xlane.xlu0 %1870 }
 0x6c7   :  { %v1873_v8 = vmul.f32 %v1871_v0, %v2291_v10  ;;  %v1879_v1 = vmul.f32 0.5, %v1878_v7  ;;  %v1898_v10 = vperm.slane %v2127_v52, 2 }
 0x6c9   :  { %v1875_v5 = vadd.f32 1e-05, %v1873_v8  ;;  %v1880_v56 = vsub.f32 1.5, %v1879_v1 }
 0x6cb   :  { %2123 = vrsqrt.f32 %v1875_v5  ;;  %v1881_v13 = vmul.f32 %v2122_v23, %v1880_v56  ;;  %vm1892_vm1 = vweird.f32 %v1875_v5 }
 0x6cd   :  { %v1885_v19 = vsel %vm1884_vm14, %v2122_v23, %v1881_v13 }
 0x6ce   :  { %v1896_v14 = vmul.f32 %v1885_v19, %v1862_v48 }
 0x6d0   :  { %v1900_v17 = vmul.f32 %v1898_v10, %v1896_v14 }
 0x6d1   :  { %v2124_v12 = vpop.eup %2123 }
 0x6d2   :  { %v1887_v11 = vmul.f32 %v2124_v12, %v1875_v5  ;;  %v1904_v4 = vadd.f32 %v1902_v20, %v1900_v17  ;;  %vm1893_vm15 = vweird.f32 %v2124_v12 }
 0x6d3   :  { %vm1894_vm2 = vmor %vm1892_vm1, %vm1893_vm15 }
 0x6d4   :  { %v1888_v62 = vmul.f32 %v2124_v12, %v1887_v11  ;;  %2039 = vmatmul.msk.f32.vlgmr.msrb.gmra.mxu0 %vm72_vm0, %v1904_v4 }
 0x6d6   :  { %v1889_v21 = vmul.f32 0.5, %v1888_v62 }
 0x6d8   :  { %v1890_v26 = vsub.f32 1.5, %v1889_v21 }
 0x6da   :  { %v1891_v28 = vmul.f32 %v2124_v12, %v1890_v26 }
 0x6dc   :  { %v1895_v34 = vsel %vm1894_vm2, %v2124_v12, %v1891_v28 }
 0x6dd   :  { %v1897_v35 = vmul.f32 %v1895_v34, %v1863_v49 }
 0x6df   :  { %v1901_v59 = vmul.f32 %v1899_v33, %v1897_v35 }
 0x6e1   :  { %v1905_v32 = vadd.f32 %v1903_v18, %v1901_v59 }
 0x6e3   :  { %2040 = vmatmul.msk.f32.gmra.mxu0 %vm72_vm0, %v1905_v32 }
 0x751   :  { %v1937_v30 = vpop.f32.mrf.mxu0 }
 0x752   :  { %v1938_v45 = vadd.f32 %v2081_v39, %v1937_v30 }
 0x754   :  { %v1943_v6 = vmax.f32 %v1938_v45, 0.0 }
 0x756   :  { %2041 = vmatmul.msk.f32.vlgmr.msra.gmra.mxu1 %vm1957_vm3, %v1943_v6 }
 0x760   :  { %v1940_v37 = vpop.f32.mrf.mxu0 }
 0x761   :  { %v1941_v40 = vadd.f32 %v2081_v39, %v1940_v37 }
 0x763   :  { %v1944_v61 = vmax.f32 %v1941_v40, 0.0 }
 0x765   :  { %2042 = vmatmul.msk.f32.gmra.mxu1 %vm1957_vm3, %v1944_v61 }
 0x7d3   :  { %v1981_v46 = vpop.f32.mrf.mxu1 }
 0x7d4   :  { %v1982_v63 = vadd.f32 %v2082_v25, %v1981_v46 }
 0x7d6   :  { %v1987_v48 = vadd.f32 %v1982_v63, %v2897_v44 }
 0x7d8   :  { %1989 = vst.msk [vmem:[#allocation7] sm:$0xff] %vm72_vm0, %v1987_v48 }
 0x7e2   :  { %v1984_v3 = vpop.f32.mrf.mxu1 }
 0x7e3   :  { %v1985_v15 = vadd.f32 %v2082_v25, %v1984_v3 }
 0x7e5   :  { %v1988_v27 = vadd.f32 %v1985_v15, %v2901_v41 }
 0x7e7   :  { %1990 = vst.msk [vmem:[#allocation7 + $0x8] sm:$0xff] %vm72_vm0, %v1988_v27 }
 0x7e8   :  { %2003 = dma.vmem_to_hbm [thread:$0]  %s1996_s8, 256, %s1998_s12, [#allocation4], %s2208_s21, %s2208_s21, %s2209_s22  }
 0x7e9   :  { %2205 = dma.done.wait [#allocation4], 256  }
 0x7ea   :  { %2206 = vsyncadd [#allocation4], 4294967040 }
 0x7eb   :  { %2008 = vsyncpa [#allocation3], 1 }
 0x7ec   :  { %2009 = vsyncpa [#allocation6], 1 }
 0x7ed   :  { %2010 = vsyncpa [#allocation4], 1 }

</bundles_post_ra>
